<compile_context>
chip_gen: v7x
topology: tpu7x:2x2x1
jax: 0.10.0
libtpu: 0.0.40
codegen_flags: <defaults>
</compile_context>

<pallas_src>
import functools
import math

import jax
import jax.numpy as jnp
from jax import lax
from jax.experimental import pallas as pl
from jax.experimental.pallas import tpu as pltpu


# ----------------------------- Pallas kernel -------------------------------


def music_block_kernel(
    x_ref, mask_ref,
    wq_ref, bq_ref, wk_ref, bk_ref, wv_ref, bv_ref, wo_ref, bo_ref,
    g1_ref, be1_ref,                         # layernorm 1
    w1_ref, bf1_ref, w2_ref, bf2_ref,        # feed-forward
    g2_ref, be2_ref,                         # layernorm 2
    wh_ref, bh_ref,                          # fused (note|dur) heads, lane-padded
    note_out_ref, dur_out_ref, attn_out_ref,
    *, num_heads, key_dim, vn_pad, vd_pad, t_pad, mm_dtype):
  Bb, T, D = x_ref.shape                     # block of Bb sequences
  H, K = num_heads, key_dim
  M = Bb * T

  x = x_ref[...].reshape(M, D)               # (M, D) f32, rows = (b, t)

  def mm(a, b):                              # MXU matmul, f32 accumulate
    return jnp.dot(a.astype(mm_dtype), b.astype(mm_dtype),
                   preferred_element_type=jnp.float32)

  # QKV projections: single (M, D) x (D, H*K) matmuls.
  # (1/sqrt(K) attention scale is already folded into wq/bq by the wrapper.)
  q = mm(x, wq_ref[...]) + bq_ref[...]
  k = mm(x, wk_ref[...]) + bk_ref[...]
  v = mm(x, wv_ref[...]) + bv_ref[...]

  def split_heads(z2):
    # (M, H*K) -> (Bb*H, T, K): one reshape + one transpose (no per-head
    # slicing/concat); batch index n = b*H + h (b-major).
    return z2.reshape(Bb, T, H, K).transpose(0, 2, 1, 3).reshape(Bb * H, T, K)

  def merge_heads(z3):
    # inverse of split_heads: (Bb*H, T, K) -> (M, H*K)
    return z3.reshape(Bb, H, T, K).transpose(0, 2, 1, 3).reshape(M, H * K)

  qh = split_heads(q)
  kh = split_heads(k)
  vh = split_heads(v)

  # One batched score einsum over all (sequence, head) pairs.
  s = jnp.einsum('nqk,nsk->nqs', qh.astype(mm_dtype), kh.astype(mm_dtype),
                 preferred_element_type=jnp.float32)
  s = s + mask_ref[...][None, :, :]          # additive causal mask (f32)
  m = jnp.max(s, axis=-1, keepdims=True)
  p = jnp.exp(s - m)
  a = p / jnp.sum(p, axis=-1, keepdims=True)  # exact softmax (rows sum to 1)

  # Single store of per-head post-softmax scores (bf16 by default; lane-padded
  # only when T is large and not a multiple of 128).
  a_st = a
  if t_pad != T:
    a_st = jnp.concatenate(
        [a, jnp.zeros((Bb * H, T, t_pad - T), jnp.float32)], axis=-1)
  attn_out_ref[...] = a_st.reshape(Bb, H, T, t_pad).astype(attn_out_ref.dtype)

  # Batched context einsum, merge heads, single (M, H*K) x (H*K, D) output
  # projection (no 4-D transpose / per-head matmuls / head-sum).
  ctx = jnp.einsum('nqs,nsk->nqk', a.astype(mm_dtype), vh.astype(mm_dtype),
                   preferred_element_type=jnp.float32)       # (Bb*H, T, K)
  attn_proj = mm(merge_heads(ctx), wo_ref[...]) + bo_ref[...]  # (M, D)

  def layer_norm(y, gamma, beta, eps=1e-6):
    mu = jnp.mean(y, axis=-1, keepdims=True)
    var = jnp.mean((y - mu) ** 2, axis=-1, keepdims=True)
    return (y - mu) * lax.rsqrt(var + eps) * gamma + beta

  # TODO(synk): dropout is a no-op here (inference semantics, rate ignored).
  out1 = layer_norm(x + attn_proj, g1_ref[...], be1_ref[...])

  h1 = jnp.maximum(mm(out1, w1_ref[...]) + bf1_ref[...], 0.0)
  h2 = mm(h1, w2_ref[...]) + bf2_ref[...]
  out2 = layer_norm(out1 + h2, g2_ref[...], be2_ref[...])

  def log_softmax(z):
    zm = z - jnp.max(z, axis=-1, keepdims=True)
    return zm - jnp.log(jnp.sum(jnp.exp(zm), axis=-1, keepdims=True))

  # Fused vocab-head matmul; padded columns carry zero weight and a -1e30 f32
  # bias so they contribute exp(.) == 0 to the normalizer (log-softmax over
  # real vocab entries is exact). Outputs are 128-lane-dense slabs.
  logits = mm(out2, wh_ref[...]) + bh_ref[...]                # (M, vn_pad+vd_pad)
  note_out_ref[...] = log_softmax(logits[:, :vn_pad]).reshape(Bb, T, vn_pad)
  dur_out_ref[...] = log_softmax(
      logits[:, vn_pad:vn_pad + vd_pad]).reshape(Bb, T, vd_pad)


# --------------------------- launch planning --------------------------------


def _tpu_generation():
  try:
    kind = jax.devices()[0].device_kind.lower()
  except Exception:
    kind = ""
  for gen in (7, 6, 5):
    if "v%d" % gen in kind:
      return gen
  return 6


def _vmem_bytes_estimate(bb, T, D, H, K, ff_dim, vn_pad, vd_pad, t_pad,
                         weight_bytes, attn_itemsize):
  """Generous per-grid-step live-set estimate (bytes)."""
  f32 = 4
  M = bb * T
  x_in = 2 * bb * T * D * f32                          # double-buffered input
  outs = 2 * (bb * T * (vn_pad + vd_pad) * f32
              + bb * H * T * t_pad * attn_itemsize)    # double-buffered outputs
  w = 2 * weight_bytes                                 # weights (+mask), 2 bufs
  inter = (4 * M * H * K * f32                         # q, k, v, ctx
           + 3 * bb * H * T * T * f32                  # s, p, a
           + M * ff_dim * f32                          # ffn hidden
           + M * (vn_pad + vd_pad) * f32               # fused logits
           + 4 * M * D * f32)                          # x, residuals, LN temps
  return x_in + outs + w + inter


def _plan_launch(B, T, D, H, K, ff_dim, vn_pad, vd_pad, t_pad,
                 weight_bytes, attn_itemsize):
  """Pick the batch block Bb and a matching VMEM limit per TPU generation."""
  gen = _tpu_generation()
  mib = 1 << 20
  # v7x: 64 MiB VMEM/TC -> explicit ~48 MiB cap; v5e/v6e: 128 MiB physical.
  vmem_cap = 48 * mib if gen == 7 else 96 * mib
  # Single-TC chips: big blocks amortize the ~0.35us/step overhead; v7x keeps
  # the per-core block a bit smaller since the grid is split across 2 TCs.
  target_rows = 512 if gen == 7 else 1024

  def budget(bb):
    return _vmem_bytes_estimate(bb, T, D, H, K, ff_dim, vn_pad, vd_pad,
                                t_pad, weight_bytes, attn_itemsize)

  divisors = [d for d in range(1, B + 1) if B % d == 0]
  fits = [d for d in divisors
          if (d == 1 or d * T <= target_rows) and budget(d) <= vmem_cap]
  fits = fits or [1]
  bb = max(fits)

  if gen == 7:
    # Two TensorCores: prefer >=2 (ideally an even number of) grid steps so
    # the "parallel" axis shards evenly; no such shrink on v5e/v6e.
    even = [d for d in fits if B // d >= 2 and (B // d) % 2 == 0]
    ge2 = [d for d in fits if B // d >= 2]
    if even:
      bb = max(even)
    elif ge2:
      bb = max(ge2)

  vmem_limit = int(min(vmem_cap, max(int(budget(bb) * 1.5), 32 * mib)))
  return bb, vmem_limit


# ------------------------------ JAX wrapper ---------------------------------


def sine_position_encoding(seq_len, d):
  pos = jnp.arange(seq_len, dtype=jnp.float32)[:, None]
  i = jnp.arange(d)[None, :]
  rates = 1.0 / jnp.power(10000.0, (2 * (i // 2)).astype(jnp.float32) / d)
  angles = pos * rates
  return jnp.where(i % 2 == 0, jnp.sin(angles), jnp.cos(angles))


def music_model_forward(note, duration, params, *, num_heads, key_dim,
                        matmul_dtype=jnp.bfloat16,
                        attn_scores_dtype=jnp.bfloat16):
  # matmul_dtype=bf16 (default) keeps f32 accumulation / elementwise; pass
  # jnp.float32 for bit-closer parity with the PyTorch reference.
  # attn_scores_dtype=bf16 halves the O(T^2) attention writeback; pass
  # jnp.float32 to return full-precision attention probabilities.
  B, T = note.shape
  half = params["note_emb"].shape[1]
  pos = sine_position_encoding(T, half)

  # Embedding gather + positional encoding + concat (glue, plain JAX).
  note_emb = params["note_emb"][note] + pos[None]
  dur_emb = params["dur_emb"][duration] + pos[None]
  x = jnp.concatenate([note_emb, dur_emb], axis=-1).astype(jnp.float32)  # (B,T,D)
  D = x.shape[-1]
  H, K = num_heads, key_dim
  ff_dim = params["w_ff1"].shape[1]

  Vn = params["w_note"].shape[1]
  Vd = params["w_dur"].shape[1]
  LANE = 128
  vn_pad = -(-Vn // LANE) * LANE
  vd_pad = -(-Vd // LANE) * LANE
  # Lane-pad the attention output only when T is large and not a multiple of
  # 128 (padding tiny T would multiply writeback bytes instead of saving).
  t_pad = (-(-T // LANE) * LANE) if (T >= LANE and T % LANE != 0) else T

  def mmw(w):  # large MXU weights -> matmul dtype (bf16 by default)
    return w.astype(matmul_dtype)

  scale = 1.0 / math.sqrt(K)
  wq = mmw(params["wq"] * scale)   # attention scale folded into W_q / b_q
  bq = params["bq"] * scale
  wk = mmw(params["wk"])
  wv = mmw(params["wv"])
  wo = mmw(params["wo"])           # kept as (H*K, D) for the merged projection
  w_ff1 = mmw(params["w_ff1"])
  w_ff2 = mmw(params["w_ff2"])

  # Fused, lane-padded head weights. Padded columns get zero weight and a
  # -1e30 f32 bias so log-softmax over the padded axis equals log-softmax over
  # the real vocab.
  w_heads = jnp.zeros((D, vn_pad + vd_pad), jnp.float32)
  w_heads = w_heads.at[:, :Vn].set(params["w_note"])
  w_heads = w_heads.at[:, vn_pad:vn_pad + Vd].set(params["w_dur"])
  w_heads = mmw(w_heads)
  b_heads = jnp.full((1, vn_pad + vd_pad), -1e30, jnp.float32)  # stays f32
  b_heads = b_heads.at[:, :Vn].set(params["b_note"])
  b_heads = b_heads.at[:, vn_pad:vn_pad + Vd].set(params["b_dur"])

  # Grid-invariant additive causal mask, precomputed once in the wrapper.
  causal = jnp.arange(T)[:, None] >= jnp.arange(T)[None, :]
  attn_mask = jnp.where(causal, 0.0, -1e9).astype(jnp.float32)

  weights = [wq, bq, wk, params["bk"], wv, params["bv"], wo, params["bo"],
             params["g1"], params["be1"],
             w_ff1, params["b_ff1"], w_ff2, params["b_ff2"],
             params["g2"], params["be2"],
             w_heads, b_heads]

  weight_bytes = sum(int(w.size) * jnp.dtype(w.dtype).itemsize for w in weights)
  weight_bytes += int(attn_mask.size) * 4
  attn_itemsize = jnp.dtype(attn_scores_dtype).itemsize

  Bb, vmem_limit = _plan_launch(B, T, D, H, K, ff_dim, vn_pad, vd_pad, t_pad,
                                weight_bytes, attn_itemsize)
  grid = (B // Bb,)

  def const_spec(shape):
    zeros = (0,) * len(shape)
    return pl.BlockSpec(shape, lambda i, z=zeros: z)

  in_specs = [pl.BlockSpec((Bb, T, D), lambda i: (i, 0, 0)),
              const_spec(tuple(attn_mask.shape))]
  in_specs += [const_spec(tuple(w.shape)) for w in weights]

  out_specs = [pl.BlockSpec((Bb, T, vn_pad), lambda i: (i, 0, 0)),
               pl.BlockSpec((Bb, T, vd_pad), lambda i: (i, 0, 0)),
               pl.BlockSpec((Bb, H, T, t_pad), lambda i: (i, 0, 0, 0))]
  out_shape = (jax.ShapeDtypeStruct((B, T, vn_pad), jnp.float32),
               jax.ShapeDtypeStruct((B, T, vd_pad), jnp.float32),
               jax.ShapeDtypeStruct((B, H, T, t_pad), attn_scores_dtype))

  kernel = functools.partial(music_block_kernel,
                             num_heads=H, key_dim=K,
                             vn_pad=vn_pad, vd_pad=vd_pad, t_pad=t_pad,
                             mm_dtype=matmul_dtype)

  fn = pl.pallas_call(
      kernel,
      out_shape=out_shape,
      grid_spec=pltpu.PrefetchScalarGridSpec(
          num_scalar_prefetch=0,
          grid=grid,
          in_specs=in_specs,
          out_specs=out_specs),
      compiler_params=pltpu.CompilerParams(
          dimension_semantics=("parallel",),
          vmem_limit_bytes=vmem_limit),
  )
  note_p, dur_p, attn = fn(x, attn_mask, *weights)
  if t_pad != T:
    attn = attn[..., :T]
  # Slice the lane-padded logit slabs back to the real vocab sizes.
  return note_p[..., :Vn], dur_p[..., :Vd], attn


# --------------------------- parameter construction --------------------------


def make_params(key, *, notes_vocab, durations_vocab, embed_dim, num_heads,
                key_dim, ff_dim):
  def xavier(k, shape, gain=1.0):
    fan_in, fan_out = shape
    lim = gain * math.sqrt(6.0 / (fan_in + fan_out))
    return jax.random.uniform(k, shape, jnp.float32, -lim, lim)

  hk = num_heads * key_dim
  ks = jax.random.split(key, 12)
  p = {
      "note_emb": 0.02 * jax.random.normal(ks[0], (notes_vocab, embed_dim // 2), jnp.float32),
      "dur_emb": 0.02 * jax.random.normal(ks[1], (durations_vocab, embed_dim // 2), jnp.float32),
      "wq": xavier(ks[2], (embed_dim, hk)), "bq": jnp.zeros((1, hk), jnp.float32),
      "wk": xavier(ks[3], (embed_dim, hk)), "bk": jnp.zeros((1, hk), jnp.float32),
      "wv": xavier(ks[4], (embed_dim, hk)), "bv": jnp.zeros((1, hk), jnp.float32),
      "wo": xavier(ks[5], (hk, embed_dim)), "bo": jnp.zeros((1, embed_dim), jnp.float32),
      "g1": jnp.ones((1, embed_dim), jnp.float32), "be1": jnp.zeros((1, embed_dim), jnp.float32),
      "w_ff1": xavier(ks[6], (embed_dim, ff_dim)), "b_ff1": jnp.zeros((1, ff_dim), jnp.float32),
      "w_ff2": xavier(ks[7], (ff_dim, embed_dim)), "b_ff2": jnp.zeros((1, embed_dim), jnp.float32),
      "g2": jnp.ones((1, embed_dim), jnp.float32), "be2": jnp.zeros((1, embed_dim), jnp.float32),
      "w_note": xavier(ks[8], (embed_dim, notes_vocab), gain=0.02),
      "b_note": jnp.zeros((1, notes_vocab), jnp.float32),
      "w_dur": xavier(ks[9], (embed_dim, durations_vocab), gain=0.02),
      "b_dur": jnp.zeros((1, durations_vocab), jnp.float32),
  }
  return p


if __name__ == "__main__":
  # Small, shape-consistent config.
  B, T = 2, 8
  NOTES_VOCAB, DUR_VOCAB = 16, 12
  EMBED_DIM, NUM_HEADS, KEY_DIM, FF_DIM = 32, 4, 8, 64

  root = jax.random.PRNGKey(0)
  k_params, k_note, k_dur = jax.random.split(root, 3)

  params = make_params(k_params, notes_vocab=NOTES_VOCAB,
                       durations_vocab=DUR_VOCAB, embed_dim=EMBED_DIM,
                       num_heads=NUM_HEADS, key_dim=KEY_DIM, ff_dim=FF_DIM)

  note = jax.random.randint(k_note, (B, T), 0, NOTES_VOCAB, dtype=jnp.int32)
  duration = jax.random.randint(k_dur, (B, T), 0, DUR_VOCAB, dtype=jnp.int32)

  out_note, out_duration, attn_scores = music_model_forward(
      note, duration, params, num_heads=NUM_HEADS, key_dim=KEY_DIM)
  jax.block_until_ready((out_note, out_duration, attn_scores))

  assert out_note.shape == (B, T, NOTES_VOCAB)
  assert out_duration.shape == (B, T, DUR_VOCAB)
  assert attn_scores.shape == (B, NUM_HEADS, T, T)
  assert bool(jnp.isfinite(out_note).all())
  assert bool(jnp.isfinite(out_duration).all())
  assert bool(jnp.isfinite(attn_scores.astype(jnp.float32)).all())
  print("KERNEL_OK")
</pallas_src>

<mosaic_0001>
module attributes {stable_mosaic.version = 11 : i64} {
  func.func @music_block_kernel(%arg0: i32, %arg1: memref<2x8x32xf32, #tpu.memory_space<vmem>>, %arg2: memref<8x8xf32, #tpu.memory_space<vmem>>, %arg3: memref<32x32xbf16, #tpu.memory_space<vmem>>, %arg4: memref<1x32xf32, #tpu.memory_space<vmem>>, %arg5: memref<32x32xbf16, #tpu.memory_space<vmem>>, %arg6: memref<1x32xf32, #tpu.memory_space<vmem>>, %arg7: memref<32x32xbf16, #tpu.memory_space<vmem>>, %arg8: memref<1x32xf32, #tpu.memory_space<vmem>>, %arg9: memref<32x32xbf16, #tpu.memory_space<vmem>>, %arg10: memref<1x32xf32, #tpu.memory_space<vmem>>, %arg11: memref<1x32xf32, #tpu.memory_space<vmem>>, %arg12: memref<1x32xf32, #tpu.memory_space<vmem>>, %arg13: memref<32x64xbf16, #tpu.memory_space<vmem>>, %arg14: memref<1x64xf32, #tpu.memory_space<vmem>>, %arg15: memref<64x32xbf16, #tpu.memory_space<vmem>>, %arg16: memref<1x32xf32, #tpu.memory_space<vmem>>, %arg17: memref<1x32xf32, #tpu.memory_space<vmem>>, %arg18: memref<1x32xf32, #tpu.memory_space<vmem>>, %arg19: memref<32x256xbf16, #tpu.memory_space<vmem>>, %arg20: memref<1x256xf32, #tpu.memory_space<vmem>>, %arg21: memref<2x8x128xf32, #tpu.memory_space<vmem>>, %arg22: memref<2x8x128xf32, #tpu.memory_space<vmem>>, %arg23: memref<2x4x8x8xbf16, #tpu.memory_space<vmem>>) attributes {dimension_semantics = [#tpu.dimension_semantics<parallel>], iteration_bounds = array<i64: 1>, scalar_prefetch = 0 : i64, scratch_operands = 0 : i64, tpu.core_type = #tpu.core_type<tc>, window_params = [{transform_indices = @transform_0, window_bounds = array<i64: 2, 8, 32>}, {pipeline_mode = #tpu.pipeline_mode<synchronous>, transform_indices = @transform_1, window_bounds = array<i64: 8, 8>}, {pipeline_mode = #tpu.pipeline_mode<synchronous>, transform_indices = @transform_2, window_bounds = array<i64: 32, 32>}, {pipeline_mode = #tpu.pipeline_mode<synchronous>, transform_indices = @transform_3, window_bounds = array<i64: 1, 32>}, {pipeline_mode = #tpu.pipeline_mode<synchronous>, transform_indices = @transform_4, window_bounds = array<i64: 32, 32>}, {pipeline_mode = #tpu.pipeline_mode<synchronous>, transform_indices = @transform_5, window_bounds = array<i64: 1, 32>}, {pipeline_mode = #tpu.pipeline_mode<synchronous>, transform_indices = @transform_6, window_bounds = array<i64: 32, 32>}, {pipeline_mode = #tpu.pipeline_mode<synchronous>, transform_indices = @transform_7, window_bounds = array<i64: 1, 32>}, {pipeline_mode = #tpu.pipeline_mode<synchronous>, transform_indices = @transform_8, window_bounds = array<i64: 32, 32>}, {pipeline_mode = #tpu.pipeline_mode<synchronous>, transform_indices = @transform_9, window_bounds = array<i64: 1, 32>}, {pipeline_mode = #tpu.pipeline_mode<synchronous>, transform_indices = @transform_10, window_bounds = array<i64: 1, 32>}, {pipeline_mode = #tpu.pipeline_mode<synchronous>, transform_indices = @transform_11, window_bounds = array<i64: 1, 32>}, {pipeline_mode = #tpu.pipeline_mode<synchronous>, transform_indices = @transform_12, window_bounds = array<i64: 32, 64>}, {pipeline_mode = #tpu.pipeline_mode<synchronous>, transform_indices = @transform_13, window_bounds = array<i64: 1, 64>}, {pipeline_mode = #tpu.pipeline_mode<synchronous>, transform_indices = @transform_14, window_bounds = array<i64: 64, 32>}, {pipeline_mode = #tpu.pipeline_mode<synchronous>, transform_indices = @transform_15, window_bounds = array<i64: 1, 32>}, {pipeline_mode = #tpu.pipeline_mode<synchronous>, transform_indices = @transform_16, window_bounds = array<i64: 1, 32>}, {pipeline_mode = #tpu.pipeline_mode<synchronous>, transform_indices = @transform_17, window_bounds = array<i64: 1, 32>}, {pipeline_mode = #tpu.pipeline_mode<synchronous>, transform_indices = @transform_18, window_bounds = array<i64: 32, 256>}, {pipeline_mode = #tpu.pipeline_mode<synchronous>, transform_indices = @transform_19, window_bounds = array<i64: 1, 256>}, {transform_indices = @transform_20, window_bounds = array<i64: 2, 8, 128>}, {transform_indices = @transform_21, window_bounds = array<i64: 2, 8, 128>}, {transform_indices = @transform_22, window_bounds = array<i64: 2, 4, 8, 8>}]} {
    %c0 = arith.constant 0 : index
    %c0_0 = arith.constant 0 : index
    %c0_1 = arith.constant 0 : index
    %0 = vector.load %arg1[%c0, %c0_0, %c0_1] : memref<2x8x32xf32, #tpu.memory_space<vmem>>, vector<2x8x32xf32>
    %1 = vector.shape_cast %0 : vector<2x8x32xf32> to vector<16x32xf32>
    %c0_2 = arith.constant 0 : index
    %c0_3 = arith.constant 0 : index
    %2 = vector.load %arg3[%c0_2, %c0_3] : memref<32x32xbf16, #tpu.memory_space<vmem>>, vector<32x32xbf16>
    %3 = arith.truncf %1 : vector<16x32xf32> to vector<16x32xbf16>
    %cst = arith.constant dense<0.000000e+00> : vector<16x32xf32>
    %4 = tpu.matmul %3, %2, %cst {dimension_numbers = #tpu.dot_dimension_numbers<[1], [0], [0], [1], [0, 0, 1, 1], [], []>} : vector<16x32xbf16>, vector<32x32xbf16>, vector<16x32xf32> -> vector<16x32xf32>
    %c0_4 = arith.constant 0 : index
    %c0_5 = arith.constant 0 : index
    %5 = vector.load %arg4[%c0_4, %c0_5] : memref<1x32xf32, #tpu.memory_space<vmem>>, vector<1x32xf32>
    %6 = vector.broadcast %5 : vector<1x32xf32> to vector<16x32xf32>
    %7 = arith.addf %4, %6 : vector<16x32xf32>
    %c0_6 = arith.constant 0 : index
    %c0_7 = arith.constant 0 : index
    %8 = vector.load %arg5[%c0_6, %c0_7] : memref<32x32xbf16, #tpu.memory_space<vmem>>, vector<32x32xbf16>
    %9 = arith.truncf %1 : vector<16x32xf32> to vector<16x32xbf16>
    %cst_8 = arith.constant dense<0.000000e+00> : vector<16x32xf32>
    %10 = tpu.matmul %9, %8, %cst_8 {dimension_numbers = #tpu.dot_dimension_numbers<[1], [0], [0], [1], [0, 0, 1, 1], [], []>} : vector<16x32xbf16>, vector<32x32xbf16>, vector<16x32xf32> -> vector<16x32xf32>
    %c0_9 = arith.constant 0 : index
    %c0_10 = arith.constant 0 : index
    %11 = vector.load %arg6[%c0_9, %c0_10] : memref<1x32xf32, #tpu.memory_space<vmem>>, vector<1x32xf32>
    %12 = vector.broadcast %11 : vector<1x32xf32> to vector<16x32xf32>
    %13 = arith.addf %10, %12 : vector<16x32xf32>
    %c0_11 = arith.constant 0 : index
    %c0_12 = arith.constant 0 : index
    %14 = vector.load %arg7[%c0_11, %c0_12] : memref<32x32xbf16, #tpu.memory_space<vmem>>, vector<32x32xbf16>
    %15 = arith.truncf %1 : vector<16x32xf32> to vector<16x32xbf16>
    %cst_13 = arith.constant dense<0.000000e+00> : vector<16x32xf32>
    %16 = tpu.matmul %15, %14, %cst_13 {dimension_numbers = #tpu.dot_dimension_numbers<[1], [0], [0], [1], [0, 0, 1, 1], [], []>} : vector<16x32xbf16>, vector<32x32xbf16>, vector<16x32xf32> -> vector<16x32xf32>
    %c0_14 = arith.constant 0 : index
    %c0_15 = arith.constant 0 : index
    %17 = vector.load %arg8[%c0_14, %c0_15] : memref<1x32xf32, #tpu.memory_space<vmem>>, vector<1x32xf32>
    %18 = vector.broadcast %17 : vector<1x32xf32> to vector<16x32xf32>
    %19 = arith.addf %16, %18 : vector<16x32xf32>
    %20 = vector.shape_cast %7 : vector<16x32xf32> to vector<2x8x4x8xf32>
    %21 = tpu.transpose %20, [0, 2, 1, 3] : vector<2x8x4x8xf32> -> vector<2x4x8x8xf32>
    %22 = vector.shape_cast %21 : vector<2x4x8x8xf32> to vector<8x8x8xf32>
    %23 = vector.shape_cast %13 : vector<16x32xf32> to vector<2x8x4x8xf32>
    %24 = tpu.transpose %23, [0, 2, 1, 3] : vector<2x8x4x8xf32> -> vector<2x4x8x8xf32>
    %25 = vector.shape_cast %24 : vector<2x4x8x8xf32> to vector<8x8x8xf32>
    %26 = vector.shape_cast %19 : vector<16x32xf32> to vector<2x8x4x8xf32>
    %27 = tpu.transpose %26, [0, 2, 1, 3] : vector<2x8x4x8xf32> -> vector<2x4x8x8xf32>
    %28 = vector.shape_cast %27 : vector<2x4x8x8xf32> to vector<8x8x8xf32>
    %29 = arith.truncf %22 : vector<8x8x8xf32> to vector<8x8x8xbf16>
    %30 = arith.truncf %25 : vector<8x8x8xf32> to vector<8x8x8xbf16>
    "tpu.trace_start"() <{level = 10 : i32, message = "nqk,nsk->nqs"}> : () -> ()
    %cst_16 = arith.constant dense<0.000000e+00> : vector<8x8x8xf32>
    %31 = tpu.matmul %29, %30, %cst_16 {dimension_numbers = #tpu.dot_dimension_numbers<[2], [2], [1], [1], [0, 0, 0, 1, 1, 1], [0], [0]>} : vector<8x8x8xbf16>, vector<8x8x8xbf16>, vector<8x8x8xf32> -> vector<8x8x8xf32>
    "tpu.trace_stop"() : () -> ()
    %c0_17 = arith.constant 0 : index
    %c0_18 = arith.constant 0 : index
    %32 = vector.load %arg2[%c0_17, %c0_18] : memref<8x8xf32, #tpu.memory_space<vmem>>, vector<8x8xf32>
    %33 = vector.shape_cast %32 : vector<8x8xf32> to vector<1x8x8xf32>
    %34 = vector.broadcast %33 : vector<1x8x8xf32> to vector<8x8x8xf32>
    %35 = arith.addf %31, %34 : vector<8x8x8xf32>
    %cst_19 = arith.constant dense<0xFF800000> : vector<8x8xf32>
    %36 = vector.multi_reduction <maximumf>, %35, %cst_19 [2] : vector<8x8x8xf32> to vector<8x8xf32>
    %37 = vector.shape_cast %36 : vector<8x8xf32> to vector<8x8x1xf32>
    %38 = vector.broadcast %37 : vector<8x8x1xf32> to vector<8x8x8xf32>
    %39 = arith.subf %35, %38 : vector<8x8x8xf32>
    %40 = math.exp %39 : vector<8x8x8xf32>
    %cst_20 = arith.constant dense<0.000000e+00> : vector<8x8xf32>
    %41 = vector.multi_reduction <add>, %40, %cst_20 [2] : vector<8x8x8xf32> to vector<8x8xf32>
    %42 = vector.shape_cast %41 : vector<8x8xf32> to vector<8x8x1xf32>
    %43 = vector.broadcast %42 : vector<8x8x1xf32> to vector<8x8x8xf32>
    %44 = arith.divf %40, %43 : vector<8x8x8xf32>
    %45 = vector.shape_cast %44 : vector<8x8x8xf32> to vector<2x4x8x8xf32>
    %46 = arith.truncf %45 : vector<2x4x8x8xf32> to vector<2x4x8x8xbf16>
    %c0_21 = arith.constant 0 : index
    %c0_22 = arith.constant 0 : index
    %c0_23 = arith.constant 0 : index
    %c0_24 = arith.constant 0 : index
    %47 = vector.load %arg23[%c0_21, %c0_22, %c0_23, %c0_24] : memref<2x4x8x8xbf16, #tpu.memory_space<vmem>>, vector<2x4x8x8xbf16>
    tpu.vector_store %arg23[%c0_21, %c0_22, %c0_23, %c0_24], %46 {strides = array<i32>} : memref<2x4x8x8xbf16, #tpu.memory_space<vmem>>, vector<2x4x8x8xbf16>,
    %48 = arith.truncf %44 : vector<8x8x8xf32> to vector<8x8x8xbf16>
    %49 = arith.truncf %28 : vector<8x8x8xf32> to vector<8x8x8xbf16>
    "tpu.trace_start"() <{level = 10 : i32, message = "nqs,nsk->nqk"}> : () -> ()
    %cst_25 = arith.constant dense<0.000000e+00> : vector<8x8x8xf32>
    %50 = tpu.matmul %48, %49, %cst_25 {dimension_numbers = #tpu.dot_dimension_numbers<[2], [1], [1], [2], [0, 0, 0, 1, 1, 2], [0], [0]>} : vector<8x8x8xbf16>, vector<8x8x8xbf16>, vector<8x8x8xf32> -> vector<8x8x8xf32>
    "tpu.trace_stop"() : () -> ()
    %51 = vector.shape_cast %50 : vector<8x8x8xf32> to vector<2x4x8x8xf32>
    %52 = tpu.transpose %51, [0, 2, 1, 3] : vector<2x4x8x8xf32> -> vector<2x8x4x8xf32>
    %53 = vector.shape_cast %52 : vector<2x8x4x8xf32> to vector<16x32xf32>
    %c0_26 = arith.constant 0 : index
    %c0_27 = arith.constant 0 : index
    %54 = vector.load %arg9[%c0_26, %c0_27] : memref<32x32xbf16, #tpu.memory_space<vmem>>, vector<32x32xbf16>
    %55 = arith.truncf %53 : vector<16x32xf32> to vector<16x32xbf16>
    %cst_28 = arith.constant dense<0.000000e+00> : vector<16x32xf32>
    %56 = tpu.matmul %55, %54, %cst_28 {dimension_numbers = #tpu.dot_dimension_numbers<[1], [0], [0], [1], [0, 0, 1, 1], [], []>} : vector<16x32xbf16>, vector<32x32xbf16>, vector<16x32xf32> -> vector<16x32xf32>
    %c0_29 = arith.constant 0 : index
    %c0_30 = arith.constant 0 : index
    %57 = vector.load %arg10[%c0_29, %c0_30] : memref<1x32xf32, #tpu.memory_space<vmem>>, vector<1x32xf32>
    %58 = vector.broadcast %57 : vector<1x32xf32> to vector<16x32xf32>
    %59 = arith.addf %56, %58 : vector<16x32xf32>
    %60 = arith.addf %1, %59 : vector<16x32xf32>
    %c0_31 = arith.constant 0 : index
    %c0_32 = arith.constant 0 : index
    %61 = vector.load %arg11[%c0_31, %c0_32] : memref<1x32xf32, #tpu.memory_space<vmem>>, vector<1x32xf32>
    %c0_33 = arith.constant 0 : index
    %c0_34 = arith.constant 0 : index
    %62 = vector.load %arg12[%c0_33, %c0_34] : memref<1x32xf32, #tpu.memory_space<vmem>>, vector<1x32xf32>
    %cst_35 = arith.constant dense<0.000000e+00> : vector<16xf32>
    %63 = vector.multi_reduction <add>, %60, %cst_35 [1] : vector<16x32xf32> to vector<16xf32>
    %64 = vector.shape_cast %63 : vector<16xf32> to vector<16x1xf32>
    %cst_36 = arith.constant 3.200000e+01 : f32
    %65 = vector.broadcast %cst_36 : f32 to vector<16x1xf32>
    %66 = arith.divf %64, %65 : vector<16x1xf32>
    %67 = vector.broadcast %66 : vector<16x1xf32> to vector<16x32xf32>
    %68 = arith.subf %60, %67 : vector<16x32xf32>
    %69 = arith.mulf %68, %68 : vector<16x32xf32>
    %cst_37 = arith.constant dense<0.000000e+00> : vector<16xf32>
    %70 = vector.multi_reduction <add>, %69, %cst_37 [1] : vector<16x32xf32> to vector<16xf32>
    %71 = vector.shape_cast %70 : vector<16xf32> to vector<16x1xf32>
    %cst_38 = arith.constant 3.200000e+01 : f32
    %72 = vector.broadcast %cst_38 : f32 to vector<16x1xf32>
    %73 = arith.divf %71, %72 : vector<16x1xf32>
    %74 = vector.broadcast %66 : vector<16x1xf32> to vector<16x32xf32>
    %75 = arith.subf %60, %74 : vector<16x32xf32>
    %cst_39 = arith.constant 9.99999997E-7 : f32
    %76 = vector.broadcast %cst_39 : f32 to vector<16x1xf32>
    %77 = arith.addf %73, %76 : vector<16x1xf32>
    %78 = math.rsqrt %77 : vector<16x1xf32>
    %79 = vector.broadcast %78 : vector<16x1xf32> to vector<16x32xf32>
    %80 = arith.mulf %75, %79 : vector<16x32xf32>
    %81 = vector.broadcast %61 : vector<1x32xf32> to vector<16x32xf32>
    %82 = arith.mulf %80, %81 : vector<16x32xf32>
    %83 = vector.broadcast %62 : vector<1x32xf32> to vector<16x32xf32>
    %84 = arith.addf %82, %83 : vector<16x32xf32>
    %c0_40 = arith.constant 0 : index
    %c0_41 = arith.constant 0 : index
    %85 = vector.load %arg13[%c0_40, %c0_41] : memref<32x64xbf16, #tpu.memory_space<vmem>>, vector<32x64xbf16>
    %86 = arith.truncf %84 : vector<16x32xf32> to vector<16x32xbf16>
    %cst_42 = arith.constant dense<0.000000e+00> : vector<16x64xf32>
    %87 = tpu.matmul %86, %85, %cst_42 {dimension_numbers = #tpu.dot_dimension_numbers<[1], [0], [0], [1], [0, 0, 1, 1], [], []>} : vector<16x32xbf16>, vector<32x64xbf16>, vector<16x64xf32> -> vector<16x64xf32>
    %c0_43 = arith.constant 0 : index
    %c0_44 = arith.constant 0 : index
    %88 = vector.load %arg14[%c0_43, %c0_44] : memref<1x64xf32, #tpu.memory_space<vmem>>, vector<1x64xf32>
    %89 = vector.broadcast %88 : vector<1x64xf32> to vector<16x64xf32>
    %90 = arith.addf %87, %89 : vector<16x64xf32>
    %cst_45 = arith.constant 0.000000e+00 : f32
    %91 = vector.broadcast %cst_45 : f32 to vector<16x64xf32>
    %92 = arith.maximumf %90, %91 : vector<16x64xf32>
    %c0_46 = arith.constant 0 : index
    %c0_47 = arith.constant 0 : index
    %93 = vector.load %arg15[%c0_46, %c0_47] : memref<64x32xbf16, #tpu.memory_space<vmem>>, vector<64x32xbf16>
    %94 = arith.truncf %92 : vector<16x64xf32> to vector<16x64xbf16>
    %cst_48 = arith.constant dense<0.000000e+00> : vector<16x32xf32>
    %95 = tpu.matmul %94, %93, %cst_48 {dimension_numbers = #tpu.dot_dimension_numbers<[1], [0], [0], [1], [0, 0, 1, 1], [], []>} : vector<16x64xbf16>, vector<64x32xbf16>, vector<16x32xf32> -> vector<16x32xf32>
    %c0_49 = arith.constant 0 : index
    %c0_50 = arith.constant 0 : index
    %96 = vector.load %arg16[%c0_49, %c0_50] : memref<1x32xf32, #tpu.memory_space<vmem>>, vector<1x32xf32>
    %97 = vector.broadcast %96 : vector<1x32xf32> to vector<16x32xf32>
    %98 = arith.addf %95, %97 : vector<16x32xf32>
    %99 = arith.addf %84, %98 : vector<16x32xf32>
    %c0_51 = arith.constant 0 : index
    %c0_52 = arith.constant 0 : index
    %100 = vector.load %arg17[%c0_51, %c0_52] : memref<1x32xf32, #tpu.memory_space<vmem>>, vector<1x32xf32>
    %c0_53 = arith.constant 0 : index
    %c0_54 = arith.constant 0 : index
    %101 = vector.load %arg18[%c0_53, %c0_54] : memref<1x32xf32, #tpu.memory_space<vmem>>, vector<1x32xf32>
    %cst_55 = arith.constant dense<0.000000e+00> : vector<16xf32>
    %102 = vector.multi_reduction <add>, %99, %cst_55 [1] : vector<16x32xf32> to vector<16xf32>
    %103 = vector.shape_cast %102 : vector<16xf32> to vector<16x1xf32>
    %cst_56 = arith.constant 3.200000e+01 : f32
    %104 = vector.broadcast %cst_56 : f32 to vector<16x1xf32>
    %105 = arith.divf %103, %104 : vector<16x1xf32>
    %106 = vector.broadcast %105 : vector<16x1xf32> to vector<16x32xf32>
    %107 = arith.subf %99, %106 : vector<16x32xf32>
    %108 = arith.mulf %107, %107 : vector<16x32xf32>
    %cst_57 = arith.constant dense<0.000000e+00> : vector<16xf32>
    %109 = vector.multi_reduction <add>, %108, %cst_57 [1] : vector<16x32xf32> to vector<16xf32>
    %110 = vector.shape_cast %109 : vector<16xf32> to vector<16x1xf32>
    %cst_58 = arith.constant 3.200000e+01 : f32
    %111 = vector.broadcast %cst_58 : f32 to vector<16x1xf32>
    %112 = arith.divf %110, %111 : vector<16x1xf32>
    %113 = vector.broadcast %105 : vector<16x1xf32> to vector<16x32xf32>
    %114 = arith.subf %99, %113 : vector<16x32xf32>
    %cst_59 = arith.constant 9.99999997E-7 : f32
    %115 = vector.broadcast %cst_59 : f32 to vector<16x1xf32>
    %116 = arith.addf %112, %115 : vector<16x1xf32>
    %117 = math.rsqrt %116 : vector<16x1xf32>
    %118 = vector.broadcast %117 : vector<16x1xf32> to vector<16x32xf32>
    %119 = arith.mulf %114, %118 : vector<16x32xf32>
    %120 = vector.broadcast %100 : vector<1x32xf32> to vector<16x32xf32>
    %121 = arith.mulf %119, %120 : vector<16x32xf32>
    %122 = vector.broadcast %101 : vector<1x32xf32> to vector<16x32xf32>
    %123 = arith.addf %121, %122 : vector<16x32xf32>
    %c0_60 = arith.constant 0 : index
    %c0_61 = arith.constant 0 : index
    %124 = vector.load %arg19[%c0_60, %c0_61] : memref<32x256xbf16, #tpu.memory_space<vmem>>, vector<32x256xbf16>
    %125 = arith.truncf %123 : vector<16x32xf32> to vector<16x32xbf16>
    %cst_62 = arith.constant dense<0.000000e+00> : vector<16x256xf32>
    %126 = tpu.matmul %125, %124, %cst_62 {dimension_numbers = #tpu.dot_dimension_numbers<[1], [0], [0], [1], [0, 0, 1, 1], [], []>} : vector<16x32xbf16>, vector<32x256xbf16>, vector<16x256xf32> -> vector<16x256xf32>
    %c0_63 = arith.constant 0 : index
    %c0_64 = arith.constant 0 : index
    %127 = vector.load %arg20[%c0_63, %c0_64] : memref<1x256xf32, #tpu.memory_space<vmem>>, vector<1x256xf32>
    %128 = vector.broadcast %127 : vector<1x256xf32> to vector<16x256xf32>
    %129 = arith.addf %126, %128 : vector<16x256xf32>
    %130 = vector.extract_strided_slice %129 {offsets = [0, 0], sizes = [16, 128], strides = [1, 1]} : vector<16x256xf32> to vector<16x128xf32>
    %cst_65 = arith.constant dense<0xFF800000> : vector<16xf32>
    %131 = vector.multi_reduction <maximumf>, %130, %cst_65 [1] : vector<16x128xf32> to vector<16xf32>
    %132 = vector.shape_cast %131 : vector<16xf32> to vector<16x1xf32>
    %133 = vector.broadcast %132 : vector<16x1xf32> to vector<16x128xf32>
    %134 = arith.subf %130, %133 : vector<16x128xf32>
    %135 = math.exp %134 : vector<16x128xf32>
    %cst_66 = arith.constant dense<0.000000e+00> : vector<16xf32>
    %136 = vector.multi_reduction <add>, %135, %cst_66 [1] : vector<16x128xf32> to vector<16xf32>
    %137 = vector.shape_cast %136 : vector<16xf32> to vector<16x1xf32>
    %138 = math.log %137 : vector<16x1xf32>
    %139 = vector.broadcast %138 : vector<16x1xf32> to vector<16x128xf32>
    %140 = arith.subf %134, %139 : vector<16x128xf32>
    %141 = vector.shape_cast %140 : vector<16x128xf32> to vector<2x8x128xf32>
    %c0_67 = arith.constant 0 : index
    %c0_68 = arith.constant 0 : index
    %c0_69 = arith.constant 0 : index
    %142 = vector.load %arg21[%c0_67, %c0_68, %c0_69] : memref<2x8x128xf32, #tpu.memory_space<vmem>>, vector<2x8x128xf32>
    tpu.vector_store %arg21[%c0_67, %c0_68, %c0_69], %141 {strides = array<i32>} : memref<2x8x128xf32, #tpu.memory_space<vmem>>, vector<2x8x128xf32>,
    %143 = vector.extract_strided_slice %129 {offsets = [0, 128], sizes = [16, 128], strides = [1, 1]} : vector<16x256xf32> to vector<16x128xf32>
    %cst_70 = arith.constant dense<0xFF800000> : vector<16xf32>
    %144 = vector.multi_reduction <maximumf>, %143, %cst_70 [1] : vector<16x128xf32> to vector<16xf32>
    %145 = vector.shape_cast %144 : vector<16xf32> to vector<16x1xf32>
    %146 = vector.broadcast %145 : vector<16x1xf32> to vector<16x128xf32>
    %147 = arith.subf %143, %146 : vector<16x128xf32>
    %148 = math.exp %147 : vector<16x128xf32>
    %cst_71 = arith.constant dense<0.000000e+00> : vector<16xf32>
    %149 = vector.multi_reduction <add>, %148, %cst_71 [1] : vector<16x128xf32> to vector<16xf32>
    %150 = vector.shape_cast %149 : vector<16xf32> to vector<16x1xf32>
    %151 = math.log %150 : vector<16x1xf32>
    %152 = vector.broadcast %151 : vector<16x1xf32> to vector<16x128xf32>
    %153 = arith.subf %147, %152 : vector<16x128xf32>
    %154 = vector.shape_cast %153 : vector<16x128xf32> to vector<2x8x128xf32>
    %c0_72 = arith.constant 0 : index
    %c0_73 = arith.constant 0 : index
    %c0_74 = arith.constant 0 : index
    %155 = vector.load %arg22[%c0_72, %c0_73, %c0_74] : memref<2x8x128xf32, #tpu.memory_space<vmem>>, vector<2x8x128xf32>
    tpu.vector_store %arg22[%c0_72, %c0_73, %c0_74], %154 {strides = array<i32>} : memref<2x8x128xf32, #tpu.memory_space<vmem>>, vector<2x8x128xf32>,
    return
  }
  func.func @transform_0(%arg0: i32) -> (i32, i32, i32) {
    %c0_i32 = arith.constant 0 : i32
    %c0_i32_0 = arith.constant 0 : i32
    %c0_i32_1 = arith.constant 0 : i32
    return %arg0, %c0_i32, %c0_i32_0 : i32, i32, i32
  }
  func.func @transform_1(%arg0: i32) -> (i32, i32) {
    %c0_i32 = arith.constant 0 : i32
    %c0_i32_0 = arith.constant 0 : i32
    %c0_i32_1 = arith.constant 0 : i32
    return %c0_i32, %c0_i32_0 : i32, i32
  }
  func.func @transform_2(%arg0: i32) -> (i32, i32) {
    %c0_i32 = arith.constant 0 : i32
    %c0_i32_0 = arith.constant 0 : i32
    %c0_i32_1 = arith.constant 0 : i32
    return %c0_i32, %c0_i32_0 : i32, i32
  }
  func.func @transform_3(%arg0: i32) -> (i32, i32) {
    %c0_i32 = arith.constant 0 : i32
    %c0_i32_0 = arith.constant 0 : i32
    %c0_i32_1 = arith.constant 0 : i32
    return %c0_i32, %c0_i32_0 : i32, i32
  }
  func.func @transform_4(%arg0: i32) -> (i32, i32) {
    %c0_i32 = arith.constant 0 : i32
    %c0_i32_0 = arith.constant 0 : i32
    %c0_i32_1 = arith.constant 0 : i32
    return %c0_i32, %c0_i32_0 : i32, i32
  }
  func.func @transform_5(%arg0: i32) -> (i32, i32) {
    %c0_i32 = arith.constant 0 : i32
    %c0_i32_0 = arith.constant 0 : i32
    %c0_i32_1 = arith.constant 0 : i32
    return %c0_i32, %c0_i32_0 : i32, i32
  }
  func.func @transform_6(%arg0: i32) -> (i32, i32) {
    %c0_i32 = arith.constant 0 : i32
    %c0_i32_0 = arith.constant 0 : i32
    %c0_i32_1 = arith.constant 0 : i32
    return %c0_i32, %c0_i32_0 : i32, i32
  }
  func.func @transform_7(%arg0: i32) -> (i32, i32) {
    %c0_i32 = arith.constant 0 : i32
    %c0_i32_0 = arith.constant 0 : i32
    %c0_i32_1 = arith.constant 0 : i32
    return %c0_i32, %c0_i32_0 : i32, i32
  }
  func.func @transform_8(%arg0: i32) -> (i32, i32) {
    %c0_i32 = arith.constant 0 : i32
    %c0_i32_0 = arith.constant 0 : i32
    %c0_i32_1 = arith.constant 0 : i32
    return %c0_i32, %c0_i32_0 : i32, i32
  }
  func.func @transform_9(%arg0: i32) -> (i32, i32) {
    %c0_i32 = arith.constant 0 : i32
    %c0_i32_0 = arith.constant 0 : i32
    %c0_i32_1 = arith.constant 0 : i32
    return %c0_i32, %c0_i32_0 : i32, i32
  }
  func.func @transform_10(%arg0: i32) -> (i32, i32) {
    %c0_i32 = arith.constant 0 : i32
    %c0_i32_0 = arith.constant 0 : i32
    %c0_i32_1 = arith.constant 0 : i32
    return %c0_i32, %c0_i32_0 : i32, i32
  }
  func.func @transform_11(%arg0: i32) -> (i32, i32) {
    %c0_i32 = arith.constant 0 : i32
    %c0_i32_0 = arith.constant 0 : i32
    %c0_i32_1 = arith.constant 0 : i32
    return %c0_i32, %c0_i32_0 : i32, i32
  }
  func.func @transform_12(%arg0: i32) -> (i32, i32) {
    %c0_i32 = arith.constant 0 : i32
    %c0_i32_0 = arith.constant 0 : i32
    %c0_i32_1 = arith.constant 0 : i32
    return %c0_i32, %c0_i32_0 : i32, i32
  }
  func.func @transform_13(%arg0: i32) -> (i32, i32) {
    %c0_i32 = arith.constant 0 : i32
    %c0_i32_0 = arith.constant 0 : i32
    %c0_i32_1 = arith.constant 0 : i32
    return %c0_i32, %c0_i32_0 : i32, i32
  }
  func.func @transform_14(%arg0: i32) -> (i32, i32) {
    %c0_i32 = arith.constant 0 : i32
    %c0_i32_0 = arith.constant 0 : i32
    %c0_i32_1 = arith.constant 0 : i32
    return %c0_i32, %c0_i32_0 : i32, i32
  }
  func.func @transform_15(%arg0: i32) -> (i32, i32) {
    %c0_i32 = arith.constant 0 : i32
    %c0_i32_0 = arith.constant 0 : i32
    %c0_i32_1 = arith.constant 0 : i32
    return %c0_i32, %c0_i32_0 : i32, i32
  }
  func.func @transform_16(%arg0: i32) -> (i32, i32) {
    %c0_i32 = arith.constant 0 : i32
    %c0_i32_0 = arith.constant 0 : i32
    %c0_i32_1 = arith.constant 0 : i32
    return %c0_i32, %c0_i32_0 : i32, i32
  }
  func.func @transform_17(%arg0: i32) -> (i32, i32) {
    %c0_i32 = arith.constant 0 : i32
    %c0_i32_0 = arith.constant 0 : i32
    %c0_i32_1 = arith.constant 0 : i32
    return %c0_i32, %c0_i32_0 : i32, i32
  }
  func.func @transform_18(%arg0: i32) -> (i32, i32) {
    %c0_i32 = arith.constant 0 : i32
    %c0_i32_0 = arith.constant 0 : i32
    %c0_i32_1 = arith.constant 0 : i32
    return %c0_i32, %c0_i32_0 : i32, i32
  }
  func.func @transform_19(%arg0: i32) -> (i32, i32) {
    %c0_i32 = arith.constant 0 : i32
    %c0_i32_0 = arith.constant 0 : i32
    %c0_i32_1 = arith.constant 0 : i32
    return %c0_i32, %c0_i32_0 : i32, i32
  }
  func.func @transform_20(%arg0: i32) -> (i32, i32, i32) {
    %c0_i32 = arith.constant 0 : i32
    %c0_i32_0 = arith.constant 0 : i32
    %c0_i32_1 = arith.constant 0 : i32
    return %arg0, %c0_i32, %c0_i32_0 : i32, i32, i32
  }
  func.func @transform_21(%arg0: i32) -> (i32, i32, i32) {
    %c0_i32 = arith.constant 0 : i32
    %c0_i32_0 = arith.constant 0 : i32
    %c0_i32_1 = arith.constant 0 : i32
    return %arg0, %c0_i32, %c0_i32_0 : i32, i32, i32
  }
  func.func @transform_22(%arg0: i32) -> (i32, i32, i32, i32) {
    %c0_i32 = arith.constant 0 : i32
    %c0_i32_0 = arith.constant 0 : i32
    %c0_i32_1 = arith.constant 0 : i32
    %c0_i32_2 = arith.constant 0 : i32
    return %arg0, %c0_i32, %c0_i32_0, %c0_i32_1 : i32, i32, i32, i32
  }
}

</mosaic_0001>

<bundles_post_ra>
// kernel: tpu_custom_call.1
= control target key start
LH: loop header
LB: loop body
LE: loop exit
PB: predicated region body
PF: predicated region fallthrough
CT: control target
= control target key end

     0   :  { %s4403_s0 = inlined_call_operand.vmem [shape: f32[2,8,32], index: 0, kind: input, shape index: {}]   ;;  %s4404_s1 = inlined_call_operand.hbm [shape: f32[8,8], index: 1, kind: input, shape index: {}]   ;;  %s4405_s2 = inlined_call_operand.hbm [shape: bf16[32,32], index: 2, kind: input, shape index: {}]   ;;  %s4406_s3 = inlined_call_operand.hbm [shape: f32[1,32], index: 3, kind: input, shape index: {}]   ;;  %s4407_s4 = inlined_call_operand.hbm [shape: bf16[32,32], index: 4, kind: input, shape index: {}]   ;;  %s4408_s5 = inlined_call_operand.hbm [shape: f32[1,32], index: 5, kind: input, shape index: {}]   ;;  %s4409_s6 = inlined_call_operand.hbm [shape: bf16[32,32], index: 6, kind: input, shape index: {}]   ;;  %s4410_s7 = inlined_call_operand.hbm [shape: f32[1,32], index: 7, kind: input, shape index: {}]   ;;  %s4411_s8 = inlined_call_operand.hbm [shape: bf16[32,32], index: 8, kind: input, shape index: {}]   ;;  %s4412_s9 = inlined_call_operand.hbm [shape: f32[1,32], index: 9, kind: input, shape index: {}]   ;;  %s4413_s10 = inlined_call_operand.vmem [shape: f32[1,32], index: 10, kind: input, shape index: {}]   ;;  %s4414_s11 = inlined_call_operand.vmem [shape: f32[1,32], index: 11, kind: input, shape index: {}]   ;;  %s4415_s12 = inlined_call_operand.vmem [shape: bf16[32,64], index: 12, kind: input, shape index: {}]   ;;  %s4416_s13 = inlined_call_operand.vmem [shape: f32[1,64], index: 13, kind: input, shape index: {}]   ;;  %s4417_s14 = inlined_call_operand.vmem [shape: bf16[64,32], index: 14, kind: input, shape index: {}]   ;;  %s4418_s15 = inlined_call_operand.vmem [shape: f32[1,32], index: 15, kind: input, shape index: {}]   ;;  %s4419_s16 = inlined_call_operand.vmem [shape: f32[1,32], index: 16, kind: input, shape index: {}]   ;;  %s4420_s17 = inlined_call_operand.vmem [shape: f32[1,32], index: 17, kind: input, shape index: {}]   ;;  %s4421_s18 = inlined_call_operand.vmem [shape: bf16[32,256], index: 18, kind: input, shape index: {}]   ;;  %s4422_s19 = inlined_call_operand.vmem [shape: f32[1,256], index: 19, kind: input, shape index: {}]   ;;  %s4423_s20 = inlined_call_operand.hbm [shape: f32[2,8,128], index: 20, kind: output, shape index: {0}]   ;;  %s4424_s21 = inlined_call_operand.hbm [shape: f32[2,8,128], index: 21, kind: output, shape index: {1}]   ;;  %s4425_s22 = inlined_call_operand.hbm [shape: bf16[2,4,8,8], index: 22, kind: output, shape index: {2}]  }
   0x1   :  { %4436 = sst [smem:[#allocation28_spill]] %s4403_s0 }
   0x2   :  { %4437 = sst [smem:[#allocation29_spill]] %s4404_s1 }
   0x3   :  { %4438 = sst [smem:[#allocation30_spill]] %s4405_s2 }
   0x4   :  { %4439 = sst [smem:[#allocation31_spill]] %s4406_s3 }
   0x5   :  { %4440 = sst [smem:[#allocation32_spill]] %s4407_s4 }
   0x6   :  { %4441 = sst [smem:[#allocation33_spill]] %s4408_s5 }
   0x7   :  { %4442 = sst [smem:[#allocation34_spill]] %s4409_s6 }
   0x8   :  { %4443 = sst [smem:[#allocation35_spill]] %s4423_s20 }
   0x9   :  { %4444 = sst [smem:[#allocation36_spill]] %s4424_s21 }
   0xa   :  { %4445 = sst [smem:[#allocation37_spill]] %s4425_s22 }
   0xb   :  { %28 = vsyncpa [#allocation3], 0 }
   0xc   :  { %29 = vsyncpa [#allocation6], 0 }
   0xd   :  { %30 = vsyncpa [#allocation9], 0 }
   0xe   :  { %31 = vsyncpa [#allocation12], 0 }
   0xf   :  { %32 = vsyncpa [#allocation15], 0 }
  0x10   :  { %33 = vsyncpa [#allocation4], 0 }
  0x11   :  { %34 = vsyncpa [#allocation19], 0  ;;  %s3589_s3 = smov [#allocation5]   ;;  %s4446_s4 = sld [smem:[#allocation30_spill]] }
  0x12   :  { %s52_s28 = sshll.u32 %s3589_s3, 4  ;;  %s53_s28 = int_to_ptr.vmem [resolvable:$true] %s52_s28 }
  0x17   :  { %s3311_s0 = scalar_lea.hbm %s4446_s4, 256 }
  0x18   :  { %p3312_p0 = scmp.ne.s32.totalorder %s4446_s4, %s3311_s0  ;;  %p3315_p1 = scmp.lt.u32.totalorder %s3311_s0, %s4446_s4 }
  0x1a   :  { %p3317_p2 = pnand %p3315_p1, %p3312_p0 }
  0x1c   :  { %3320 = shalt.err (!%p3317_p2)
}
  0x1d   :  { %s3321_s6 = scalar_lea.vmem %s53_s28, 256  ;;  %p3326_p4 = scmp.lt.s32.totalorder %s53_s28, %s53_s28 }
  0x1e   :  { %p3322_p3 = scmp.ne.s32.totalorder %s53_s28, %s3321_s6  ;;  %p3327_p5 = scmp.lt.s32.totalorder %s3321_s6, %s3321_s6 }
  0x20   :  { %p3328_p6 = por %p3327_p5, %p3326_p4 }
  0x22   :  { %p3329_p7 = pnand %p3328_p6, %p3322_p3 }
  0x24   :  { %3332 = shalt.err (!%p3329_p7)
}
  0x25   :  { %s3590_s25 = smov 64   ;;  %s3591_s26 = smov 4  }
  0x26   :  { %58 = dma.hbm_to_vmem [thread:$0]  %s4446_s4, 256, %s53_s28, [#allocation6], %s3590_s25, %s3590_s25, %s3591_s26  }
  0x27   :  { %s3592_s3 = smov [#allocation8]   ;;  %s3593_s30 = smov [#allocation11]  }
  0x28   :  { %s74_s29 = sshll.u32 %s3592_s3, 4  ;;  %s96_s0 = sshll.u32 %s3593_s30, 4  ;;  %s75_s29 = int_to_ptr.vmem [resolvable:$true] %s74_s29  ;;  %s97_s0 = int_to_ptr.vmem [resolvable:$true] %s96_s0 }
  0x29   :  { %s4447_s5 = sld [smem:[#allocation32_spill]] }
  0x2f   :  { %s3333_s24 = scalar_lea.hbm %s4447_s5, 256 }
  0x30   :  { %p3334_p8 = scmp.ne.s32.totalorder %s4447_s5, %s3333_s24  ;;  %p3337_p9 = scmp.lt.u32.totalorder %s3333_s24, %s4447_s5 }
  0x32   :  { %p3339_p10 = pnand %p3337_p9, %p3334_p8 }
  0x34   :  { %3342 = shalt.err (!%p3339_p10)
}
  0x35   :  { %s3343_s28 = scalar_lea.vmem %s75_s29, 256  ;;  %p3348_p12 = scmp.lt.s32.totalorder %s75_s29, %s75_s29 }
  0x36   :  { %p3344_p11 = scmp.ne.s32.totalorder %s75_s29, %s3343_s28  ;;  %p3349_p13 = scmp.lt.s32.totalorder %s3343_s28, %s3343_s28 }
  0x38   :  { %p3350_p0 = por %p3349_p13, %p3348_p12 }
  0x3a   :  { %p3351_p1 = pnand %p3350_p0, %p3344_p11 }
  0x3c   :  { %3354 = shalt.err (!%p3351_p1)
}
  0x3d   :  { %80 = dma.hbm_to_vmem [thread:$0]  %s4447_s5, 256, %s75_s29, [#allocation9], %s3590_s25, %s3590_s25, %s3591_s26  }
  0x3e   :  { %s4448_s22 = sld [smem:[#allocation34_spill]] }
  0x44   :  { %s3355_s27 = scalar_lea.hbm %s4448_s22, 256 }
  0x45   :  { %p3356_p2 = scmp.ne.s32.totalorder %s4448_s22, %s3355_s27  ;;  %p3359_p3 = scmp.lt.u32.totalorder %s3355_s27, %s4448_s22 }
  0x47   :  { %p3361_p4 = pnand %p3359_p3, %p3356_p2 }
  0x49   :  { %3364 = shalt.err (!%p3361_p4)
}
  0x4a   :  { %s3365_s24 = scalar_lea.vmem %s97_s0, 256  ;;  %p3370_p6 = scmp.lt.s32.totalorder %s97_s0, %s97_s0 }
  0x4b   :  { %p3366_p5 = scmp.ne.s32.totalorder %s97_s0, %s3365_s24  ;;  %p3371_p7 = scmp.lt.s32.totalorder %s3365_s24, %s3365_s24 }
  0x4d   :  { %p3372_p8 = por %p3371_p7, %p3370_p6 }
  0x4f   :  { %p3373_p9 = pnand %p3372_p8, %p3366_p5 }
  0x51   :  { %3376 = shalt.err (!%p3373_p9)
}
  0x52   :  { %102 = dma.hbm_to_vmem [thread:$0]  %s4448_s22, 256, %s97_s0, [#allocation12], %s3590_s25, %s3590_s25, %s3591_s26  }
  0x53   :  { %s3594_s6 = smov [#allocation14]   ;;  %s3595_s4 = smov [#allocation2]  }
  0x54   :  { %s118_s28 = sshll.u32 %s3594_s6, 4  ;;  %s43_s2 = sshll.u32 %s3595_s4, 4  ;;  %s119_s28 = int_to_ptr.vmem [resolvable:$true] %s118_s28  ;;  %s44_s2 = int_to_ptr.vmem [resolvable:$true] %s43_s2 }
  0x55   :  { %s3377_s27 = scalar_lea.hbm %s4411_s8, 256 }
  0x56   :  { %p3378_p10 = scmp.ne.s32.totalorder %s4411_s8, %s3377_s27  ;;  %p3381_p11 = scmp.lt.u32.totalorder %s3377_s27, %s4411_s8 }
  0x58   :  { %p3383_p12 = pnand %p3381_p11, %p3378_p10 }
  0x5a   :  { %3386 = shalt.err (!%p3383_p12)
}
  0x5b   :  { %s3387_s0 = scalar_lea.vmem %s119_s28, 256  ;;  %p3392_p0 = scmp.lt.s32.totalorder %s119_s28, %s119_s28 }
  0x5c   :  { %p3388_p13 = scmp.ne.s32.totalorder %s119_s28, %s3387_s0  ;;  %p3393_p1 = scmp.lt.s32.totalorder %s3387_s0, %s3387_s0 }
  0x5e   :  { %p3394_p2 = por %p3393_p1, %p3392_p0 }
  0x60   :  { %p3395_p3 = pnand %p3394_p2, %p3388_p13 }
  0x62   :  { %3398 = shalt.err (!%p3395_p3)
}
  0x63   :  { %124 = dma.hbm_to_vmem [thread:$0]  %s4411_s8, 256, %s119_s28, [#allocation15], %s3590_s25, %s3590_s25, %s3591_s26  }
  0x64   :  { %s4449_s6 = sld [smem:[#allocation29_spill]] }
  0x6a   :  { %s3399_s4 = scalar_lea.hbm %s4449_s6, 128 }
  0x6b   :  { %p3400_p4 = scmp.ne.s32.totalorder %s4449_s6, %s3399_s4  ;;  %p3403_p5 = scmp.lt.u32.totalorder %s3399_s4, %s4449_s6 }
  0x6d   :  { %p3405_p6 = pnand %p3403_p5, %p3400_p4 }
  0x6f   :  { %3408 = shalt.err (!%p3405_p6)
}
  0x70   :  { %s3409_s30 = scalar_lea.vmem %s44_s2, 128  ;;  %p3414_p8 = scmp.lt.s32.totalorder %s44_s2, %s44_s2 }
  0x71   :  { %p3410_p7 = scmp.ne.s32.totalorder %s44_s2, %s3409_s30  ;;  %p3415_p9 = scmp.lt.s32.totalorder %s3409_s30, %s3409_s30 }
  0x73   :  { %p3416_p10 = por %p3415_p9, %p3414_p8 }
  0x75   :  { %p3417_p11 = pnand %p3416_p10, %p3410_p7 }
  0x77   :  { %3420 = shalt.err (!%p3417_p11)
}
  0x78   :  { %46 = dma.hbm_to_vmem [thread:$0]  %s4449_s6, 128, %s44_s2, [#allocation3]  }
  0x79   :  { %s3596_s23 = smov [#allocation7]   ;;  %s3597_s0 = smov [#allocation10]  }
  0x7a   :  { %s65_s1 = sshll.u32 %s3596_s23, 4  ;;  %s87_s22 = sshll.u32 %s3597_s0, 4  ;;  %s66_s1 = int_to_ptr.vmem [resolvable:$true] %s65_s1  ;;  %s88_s22 = int_to_ptr.vmem [resolvable:$true] %s87_s22 }
  0x7b   :  { %s4450_s5 = sld [smem:[#allocation31_spill]] }
  0x81   :  { %s3421_s4 = scalar_lea.hbm %s4450_s5, 16 }
  0x82   :  { %p3422_p12 = scmp.ne.s32.totalorder %s4450_s5, %s3421_s4  ;;  %p3425_p13 = scmp.lt.u32.totalorder %s3421_s4, %s4450_s5 }
  0x84   :  { %p3427_p0 = pnand %p3425_p13, %p3422_p12 }
  0x86   :  { %3430 = shalt.err (!%p3427_p0)
}
  0x87   :  { %s3431_s2 = scalar_lea.vmem %s66_s1, 16  ;;  %s3435_s6 = scalar_lea.vmem %s66_s1, 32 }
  0x88   :  { %p3432_p1 = scmp.ne.s32.totalorder %s66_s1, %s3431_s2  ;;  %p3436_p2 = scmp.lt.s32.totalorder %s66_s1, %s66_s1 }
  0x89   :  { %p3437_p3 = scmp.lt.s32.totalorder %s3435_s6, %s3431_s2 }
  0x8b   :  { %p3438_p4 = por %p3437_p3, %p3436_p2 }
  0x8d   :  { %p3439_p5 = pnand %p3438_p4, %p3432_p1 }
  0x8f   :  { %3442 = shalt.err (!%p3439_p5)
}
  0x90   :  { %68 = dma.hbm_to_vmem [thread:$0]  %s4450_s5, 16, %s66_s1, [#allocation6]  }
  0x91   :  { %s4451_s0 = sld [smem:[#allocation33_spill]] }
  0x97   :  { %s3443_s24 = scalar_lea.hbm %s4451_s0, 16 }
  0x98   :  { %p3444_p6 = scmp.ne.s32.totalorder %s4451_s0, %s3443_s24  ;;  %p3447_p7 = scmp.lt.u32.totalorder %s3443_s24, %s4451_s0 }
  0x9a   :  { %p3449_p8 = pnand %p3447_p7, %p3444_p6 }
  0x9c   :  { %3452 = shalt.err (!%p3449_p8)
}
  0x9d   :  { %s3453_s27 = scalar_lea.vmem %s88_s22, 16  ;;  %s3457_s3 = scalar_lea.vmem %s88_s22, 32 }
  0x9e   :  { %p3454_p9 = scmp.ne.s32.totalorder %s88_s22, %s3453_s27  ;;  %p3458_p10 = scmp.lt.s32.totalorder %s88_s22, %s88_s22 }
  0x9f   :  { %p3459_p11 = scmp.lt.s32.totalorder %s3457_s3, %s3453_s27 }
  0xa1   :  { %p3460_p12 = por %p3459_p11, %p3458_p10 }
  0xa3   :  { %p3461_p13 = pnand %p3460_p12, %p3454_p9 }
  0xa5   :  { %3464 = shalt.err (!%p3461_p13)
}
  0xa6   :  { %90 = dma.hbm_to_vmem [thread:$0]  %s4451_s0, 16, %s88_s22, [#allocation9]  }
  0xa7   :  { %s3598_s2 = smov [#allocation13]   ;;  %s3599_s30 = smov [#allocation16]  }
  0xa8   :  { %s109_s6 = sshll.u32 %s3598_s2, 4  ;;  %s131_s8 = sshll.u32 %s3599_s30, 4  ;;  %s110_s6 = int_to_ptr.vmem [resolvable:$true] %s109_s6  ;;  %s132_s8 = int_to_ptr.vmem [resolvable:$true] %s131_s8 }
  0xa9   :  { %s3465_s24 = scalar_lea.hbm %s4410_s7, 16 }
  0xaa   :  { %p3466_p0 = scmp.ne.s32.totalorder %s4410_s7, %s3465_s24  ;;  %p3469_p1 = scmp.lt.u32.totalorder %s3465_s24, %s4410_s7 }
  0xac   :  { %p3471_p2 = pnand %p3469_p1, %p3466_p0 }
  0xae   :  { %3474 = shalt.err (!%p3471_p2)
}
  0xaf   :  { %s3475_s22 = scalar_lea.vmem %s110_s6, 16  ;;  %s3479_s0 = scalar_lea.vmem %s110_s6, 32 }
  0xb0   :  { %p3476_p3 = scmp.ne.s32.totalorder %s110_s6, %s3475_s22  ;;  %p3480_p4 = scmp.lt.s32.totalorder %s110_s6, %s110_s6 }
  0xb1   :  { %p3481_p5 = scmp.lt.s32.totalorder %s3479_s0, %s3475_s22 }
  0xb3   :  { %p3482_p6 = por %p3481_p5, %p3480_p4 }
  0xb5   :  { %p3483_p7 = pnand %p3482_p6, %p3476_p3 }
  0xb7   :  { %3486 = shalt.err (!%p3483_p7)
}
  0xb8   :  { %112 = dma.hbm_to_vmem [thread:$0]  %s4410_s7, 16, %s110_s6, [#allocation12]  }
  0xb9   :  { %s3487_s2 = scalar_lea.hbm %s4412_s9, 16 }
  0xba   :  { %p3488_p8 = scmp.ne.s32.totalorder %s4412_s9, %s3487_s2  ;;  %p3491_p9 = scmp.lt.u32.totalorder %s3487_s2, %s4412_s9 }
  0xbc   :  { %p3493_p10 = pnand %p3491_p9, %p3488_p8 }
  0xbe   :  { %3496 = shalt.err (!%p3493_p10)
}
  0xbf   :  { %s3497_s29 = scalar_lea.vmem %s132_s8, 16  ;;  %s3501_s4 = scalar_lea.vmem %s132_s8, 32 }
  0xc0   :  { %p3498_p11 = scmp.ne.s32.totalorder %s132_s8, %s3497_s29  ;;  %p3502_p12 = scmp.lt.s32.totalorder %s132_s8, %s132_s8 }
  0xc1   :  { %p3503_p13 = scmp.lt.s32.totalorder %s3501_s4, %s3497_s29 }
  0xc3   :  { %p3504_p0 = por %p3503_p13, %p3502_p12 }
  0xc5   :  { %p3505_p1 = pnand %p3504_p0, %p3498_p11 }
  0xc7   :  { %3508 = shalt.err (!%p3505_p1)
}
  0xc8   :  { %134 = dma.hbm_to_vmem [thread:$0]  %s4412_s9, 16, %s132_s8, [#allocation15]  }
  0xc9   :  { %3575 = dma.done.wait [#allocation3], 128  }
  0xca   :  { %3576 = vsyncadd [#allocation3], 4294967168 }
  0xcb   :  { %3577 = dma.done.wait [#allocation6], 272  }
  0xcc   :  { %3578 = vsyncadd [#allocation6], 4294967024 }
  0xcd   :  { %3579 = dma.done.wait [#allocation9], 272  }
  0xce   :  { %3580 = vsyncadd [#allocation9], 4294967024 }
  0xcf   :  { %3581 = dma.done.wait [#allocation12], 272  }
  0xd0   :  { %3582 = vsyncadd [#allocation12], 4294967024 }
  0xd1   :  { %3583 = dma.done.wait [#allocation15], 272  }
  0xd2   :  { %3584 = vsyncadd [#allocation15], 4294967024  ;;  %v3600_v0 = vmov 0.0   ;;  %vm3601_vm0 = vmmov 0   ;;  %v3233_v1 = vld [vmem:[#allocation8] sm:$0xff]   ;;  %v3234_v2 = vld [vmem:[#allocation5] sm:$0xff]   ;;  %v407_v26 = vlaneseq }
  0xd3   :  { %3052 = vmatprep.subr.bf16.mxu1 %v3600_v0  ;;  %3044 = vmatprep.subr.bf16.mxu0 %v3600_v0  ;;  %v3235_v3 = vld [vmem:[#allocation8 + $0x8] sm:$0xff]   ;;  %s4452_s20 = sld [smem:[#allocation28_spill]]  ;;  %vm209_vm1 = vcmask 261120   ;;  %v3236_v6 = vld [vmem:[#allocation5 + $0x8] sm:$0xff]   ;;  %v2929_v10 = vld [vmem:[#allocation10] ss:$0 sm:$0xff] }
  0xd4   :  { %3056 = vmatprep.mubr.msk.bf16.mxu1 %vm3601_vm0, %v3600_v0  ;;  %3048 = vmatprep.mubr.msk.bf16.mxu0 %vm3601_vm0, %v3600_v0  ;;  %v3237_v8 = vld [vmem:[#allocation11] sm:$0xff]   ;;  %v3238_v9 = vld [vmem:[#allocation11 + $0x8] sm:$0xff]   ;;  %s3602_s0 = smov 104   ;;  %s3603_s27 = smov 120   ;;  %v3605_v24 = vmov 1983009808  }
  0xd5   :  { %3053 = vmatpush3.bf16.msra.mxu1 %v3233_v1  ;;  %3045 = vmatpush3.bf16.msra.mxu0 %v3234_v2  ;;  %v2925_v12 = vld [vmem:[#allocation7] ss:$0 sm:$0xff]  ;;  %s3604_s3 = smov 112   ;;  %v405_v25 = vunpack.c.l.s4 %v3605_v24  ;;  %v2933_v27 = vld [vmem:[#allocation13] ss:$0 sm:$0xff]  ;;  %v3899_v32 = vshrl.u32 %v407_v26, 7 }
  0xd6   :  { %3054 = vmatprep.subr.bf16.mxu1 %v3600_v0  ;;  %3046 = vmatprep.subr.bf16.mxu0 %v3600_v0  ;;  %v3606_v28 = vmov 1934713408   ;;  %vm1275_vm2 = vcmask 64512   ;;  %vm1760_vm3 = vcmask 1043456   ;;  %vm1740_vm4 = vcmask 60416   ;;  %s3607_s1 = smov 16  }
  0xd7   :  { %v437_v29 = vunpack.c.l.s4 %v3606_v28  ;;  %v406_v31 = vunpack.c.0.s8 %v405_v25  ;;  %s3608_s5 = smov 8   ;;  %s3609_s2 = smov 24   ;;  %vm2424_vm5 = vcmask 130048   ;;  %vm2427_vm6 = vcmask 195584  }
  0xd8   :  { %vm2655_vm7 = vcmask 523264  }
  0xd9   :  { %v183_v4 = vld [vmem:[%s4452_s20] sm:$0xff]  ;;  %v184_v5 = vld [vmem:[%s4452_s20 + $0x8] sm:$0xff]  ;;  %3055 = vmatpush3.bf16.msra.mxu1 %v3235_v3  ;;  %3047 = vmatpush3.bf16.msra.mxu0 %v3236_v6  ;;  %v438_v38 = vunpack.c.0.s8 %v437_v29  ;;  %v3908_v41 = vsub.s32 %v406_v31, %v3899_v32 }
  0xda   :  { %v189_v7 = vpack.c.bf16 %v184_v5, %v183_v4  ;;  %3068 = vmatprep.subr.bf16.mxu1 %v3600_v0  ;;  %3060 = vmatprep.subr.bf16.mxu0 %v3600_v0 }
  0xdb   :  { %v3911_v48 = vsub.s32 %v438_v38, %v3899_v32 }
  0xdc   :  { %3057 = vmatmul.mubr.msk.bf16.vlgmr.msra.gmra.mrb[0].mxu1 %vm209_vm1, %v189_v7  ;;  %3049 = vmatmul.mubr.msk.bf16.vlgmr.msra.gmra.mrb[0].mxu0 %vm209_vm1, %v189_v7 }
  0xdd   :  { %3070 = vmatprep.mubr.msk.bf16.mxu1 %vm3601_vm0, %v3600_v0  ;;  %3064 = vmatprep.mubr.msk.bf16.mxu0 %vm3601_vm0, %v3600_v0 }
  0xde   :  { %3061 = vmatpush3.bf16.msra.mxu0 %v3237_v8 }
  0xdf   :  { %3062 = vmatprep.subr.bf16.mxu0 %v3600_v0 }
  0xe2   :  { %3063 = vmatpush3.bf16.msra.mxu0 %v3238_v9 }
  0xe3   :  { %3074 = vmatprep.subr.bf16.mxu0 %v3600_v0 }
  0xe5   :  { %3065 = vmatmul.mubr.msk.bf16.vlgmr.msra.gmra.mrb[4].mxu0 %vm209_vm1, %v189_v7 }
  0xe6   :  { %3076 = vmatprep.mubr.msk.bf16.mxu0 %vm3601_vm0, %v3600_v0 }
 0x1af   :  { %v311_v11 = vpop.f32.mrb[0].mxu1  ;;  %v247_v15 = vpop.f32.mrb[0].mxu0 }
 0x1b0   :  { %v312_v13 = vadd.f32 %v2929_v10, %v311_v11  ;;  %v3058_v14 = vpop.f32.mrb[1].mxu1  ;;  %v3050_v17 = vpop.f32.mrb[1].mxu0  ;;  %v248_v19 = vadd.f32 %v2925_v12, %v247_v15 }
 0x1b1   :  { %v314_v16 = vpop.f32.mrb[2].mxu1  ;;  %v250_v20 = vpop.f32.mrb[2].mxu0 }
 0x1b2   :  { %688 = vrot.lane.b32.xlu1 %v312_v13, %s3602_s0  ;;  %676 = vrot.lane.b32.xlu0 %v312_v13, %s3603_s27  ;;  %v3059_v18 = vpop.f32.mrb[3].mxu1  ;;  %v3051_v21 = vpop.f32.mrb[3].mxu0  ;;  %v3883_v22 = vadd.f32 %v2929_v10, %v314_v16  ;;  %v3889_v23 = vadd.f32 %v2925_v12, %v250_v20 }
 0x1b6   :  { %682 = vrot.lane.b32.xlu0 %v312_v13, %s3604_s3  ;;  %384 = vrot.lane.b32.xlu1 %v248_v19, %s3603_s27 }
 0x1b8   :  { %v375_v30 = vpop.f32.mrb[4].mxu0 }
 0x1b9   :  { %v3901_v33 = vadd.f32 %v2933_v27, %v375_v30  ;;  %v3066_v34 = vpop.f32.mrb[5].mxu0 }
 0x1ba   :  { %390 = vrot.lane.b32.xlu0 %v248_v19, %s3604_s3  ;;  %396 = vrot.lane.b32.xlu1 %v248_v19, %s3602_s0  ;;  %v378_v37 = vpop.f32.mrb[6].mxu0 }
 0x1bb   :  { %v3905_v39 = vadd.f32 %v2933_v27, %v378_v37  ;;  %v3067_v40 = vpop.f32.mrb[7].mxu0 }
 0x1be   :  { %678 = vrot.lane.b32.xlu0 %v3883_v22, %s3603_s27  ;;  %684 = vrot.lane.b32.xlu1 %v3883_v22, %s3604_s3 }
 0x1c2   :  { %690 = vrot.lane.b32.xlu0 %v3883_v22, %s3602_s0  ;;  %386 = vrot.lane.b32.xlu1 %v3889_v23, %s3603_s27 }
 0x1c6   :  { %392 = vrot.lane.b32.xlu0 %v3889_v23, %s3604_s3  ;;  %398 = vrot.lane.b32.xlu1 %v3889_v23, %s3602_s0 }
 0x1ca   :  { %968 = vrot.lane.b32.xlu1 %v3901_v33, %s3603_s27 }
 0x224   :  { %v689_v35 = vpop.permute.xlu1 %688  ;;  %v677_v36 = vpop.permute.xlu0 %676 }
 0x225   :  { %v710_v42 = vcombine.low %v677_v36, %v689_v35  ;;  %v711_v43 = vcombine.high %v677_v36, %v689_v35 }
 0x227   :  { %v718_v49 = vrot.slane %v710_v42, %v3908_v41  ;;  %v725_v50 = vrot.slane %v711_v43, %v3908_v41 }
 0x228   :  { %v683_v44 = vpop.permute.xlu0 %682  ;;  %v385_v45 = vpop.permute.xlu1 %384 }
 0x229   :  { %v694_v46 = vcombine.low %v312_v13, %v683_v44  ;;  %v695_v47 = vcombine.high %v312_v13, %v683_v44 }
 0x22b   :  { %v702_v51 = vrot.slane %v694_v46, %v3908_v41  ;;  %v709_v52 = vrot.slane %v695_v47, %v3908_v41 }
 0x22c   :  { %v391_v53 = vpop.permute.xlu0 %390  ;;  %v397_v54 = vpop.permute.xlu1 %396 }
 0x22d   :  { %v726_v55 = vcombine.low %v702_v51, %v718_v49  ;;  %v727_v56 = vcombine.high %v702_v51, %v718_v49  ;;  %v742_v57 = vcombine.low %v709_v52, %v725_v50  ;;  %v743_v58 = vcombine.high %v709_v52, %v725_v50 }
 0x22e   :  { %v402_v59 = vcombine.low %v248_v19, %v391_v53  ;;  %v403_v60 = vcombine.high %v248_v19, %v391_v53  ;;  %v418_v61 = vcombine.low %v385_v45, %v397_v54  ;;  %v419_v62 = vcombine.high %v385_v45, %v397_v54 }
 0x22f   :  { %v734_v63 = vrot.slane %v726_v55, %v3911_v48  ;;  %v741_v1 = vrot.slane %v727_v56, %v3911_v48  ;;  %v750_v2 = vrot.slane %v742_v57, %v3911_v48  ;;  %v757_v3 = vrot.slane %v743_v58, %v3911_v48 }
 0x230   :  { %v410_v4 = vrot.slane %v402_v59, %v3908_v41  ;;  %v417_v5 = vrot.slane %v403_v60, %v3908_v41  ;;  %v426_v6 = vrot.slane %v418_v61, %v3908_v41  ;;  %v433_v7 = vrot.slane %v419_v62, %v3908_v41  ;;  %v679_v8 = vpop.permute.xlu0 %678  ;;  %v685_v9 = vpop.permute.xlu1 %684 }
 0x231   :  { %v830_v14 = vcombine.low %v734_v63, %v741_v1  ;;  %v2941_v15 = vcombine.high %v734_v63, %v741_v1  ;;  %v846_v16 = vcombine.low %v750_v2, %v757_v3  ;;  %v2942_v17 = vcombine.high %v750_v2, %v757_v3 }
 0x232   :  { %v434_v10 = vcombine.low %v410_v4, %v426_v6  ;;  %v435_v11 = vcombine.high %v410_v4, %v426_v6  ;;  %v450_v12 = vcombine.low %v417_v5, %v433_v7  ;;  %v451_v13 = vcombine.high %v417_v5, %v433_v7 }
 0x233   :  { %v762_v26 = vcombine.low %v3883_v22, %v685_v9  ;;  %v763_v27 = vcombine.high %v3883_v22, %v685_v9  ;;  %v837_v47 = vrot.slane %v830_v14, %v3908_v41  ;;  %v845_v49 = vrot.slane %v2941_v15, %v3908_v41 }
 0x234   :  { %v442_v18 = vrot.slane %v434_v10, %v3911_v48  ;;  %v449_v19 = vrot.slane %v435_v11, %v3911_v48  ;;  %v458_v20 = vrot.slane %v450_v12, %v3911_v48  ;;  %v465_v21 = vrot.slane %v451_v13, %v3911_v48  ;;  %v691_v24 = vpop.permute.xlu0 %690  ;;  %v387_v25 = vpop.permute.xlu1 %386 }
 0x235   :  { %v778_v28 = vcombine.low %v679_v8, %v691_v24  ;;  %v779_v29 = vcombine.high %v679_v8, %v691_v24  ;;  %v770_v36 = vrot.slane %v762_v26, %v3908_v41  ;;  %v777_v37 = vrot.slane %v763_v27, %v3908_v41 }
 0x236   :  { %v538_v30 = vcombine.low %v442_v18, %v449_v19  ;;  %v2937_v31 = vcombine.high %v442_v18, %v449_v19  ;;  %v554_v34 = vcombine.low %v458_v20, %v465_v21  ;;  %v2938_v35 = vcombine.high %v458_v20, %v465_v21 }
 0x237   :  { %v786_v38 = vrot.slane %v778_v28, %v3908_v41  ;;  %v793_v40 = vrot.slane %v779_v29, %v3908_v41  ;;  %v853_v50 = vrot.slane %v846_v16, %v3908_v41  ;;  %v861_v51 = vrot.slane %v2942_v17, %v3908_v41 }
 0x238   :  { %v393_v46 = vpop.permute.xlu0 %392  ;;  %v399_v22 = vpop.permute.xlu1 %398  ;;  %v3940_v52 = vrot.slane %v538_v30, %v3908_v41  ;;  %v3943_v53 = vrot.slane %v2937_v31, %v3908_v41  ;;  %v3946_v54 = vrot.slane %v554_v34, %v3908_v41  ;;  %v3949_v55 = vrot.slane %v2938_v35, %v3908_v41 }
 0x239   :  { %v794_v42 = vcombine.low %v770_v36, %v786_v38  ;;  %v795_v43 = vcombine.high %v770_v36, %v786_v38  ;;  %v810_v44 = vcombine.low %v777_v37, %v793_v40  ;;  %v811_v45 = vcombine.high %v777_v37, %v793_v40 }
 0x23a   :  { %v470_v56 = vcombine.low %v3889_v23, %v393_v46  ;;  %v471_v57 = vcombine.high %v3889_v23, %v393_v46  ;;  %v486_v58 = vcombine.low %v387_v25, %v399_v22  ;;  %v487_v59 = vcombine.high %v387_v25, %v399_v22 }
 0x23b   :  { %v802_v60 = vrot.slane %v794_v42, %v3911_v48  ;;  %v809_v61 = vrot.slane %v795_v43, %v3911_v48  ;;  %v818_v62 = vrot.slane %v810_v44, %v3911_v48  ;;  %v825_v63 = vrot.slane %v811_v45, %v3911_v48 }
 0x23c   :  { %v478_v1 = vrot.slane %v470_v56, %v3908_v41  ;;  %v485_v2 = vrot.slane %v471_v57, %v3908_v41  ;;  %v494_v3 = vrot.slane %v486_v58, %v3908_v41  ;;  %v501_v4 = vrot.slane %v487_v59, %v3908_v41 }
 0x23d   :  { %v570_v23 = vcombine.low %v3940_v52, %v3943_v53  ;;  %v586_v5 = vcombine.low %v3946_v54, %v3949_v55  ;;  %v898_v8 = vcombine.low %v802_v60, %v809_v61  ;;  %v2943_v9 = vcombine.high %v802_v60, %v809_v61 }
 0x23e   :  { %v502_v6 = vcombine.low %v478_v1, %v494_v3  ;;  %v503_v7 = vcombine.high %v478_v1, %v494_v3  ;;  %v862_v10 = vcombine.low %v837_v47, %v845_v49  ;;  %v878_v11 = vcombine.low %v853_v50, %v861_v51 }
 0x23f   :  { %v914_v12 = vcombine.low %v818_v62, %v825_v63  ;;  %v2944_v13 = vcombine.high %v818_v62, %v825_v63  ;;  %v518_v14 = vcombine.low %v485_v2, %v501_v4  ;;  %v519_v15 = vcombine.high %v485_v2, %v501_v4 }
 0x240   :  { %v571_v16 = vcombine.high %v3940_v52, %v3943_v53  ;;  %v587_v17 = vcombine.high %v3946_v54, %v3949_v55  ;;  %v870_v18 = vrot.slane %v862_v10, %v3911_v48  ;;  %v886_v19 = vrot.slane %v878_v11, %v3911_v48 }
 0x241   :  { %v510_v20 = vrot.slane %v502_v6, %v3911_v48  ;;  %v517_v21 = vrot.slane %v503_v7, %v3911_v48  ;;  %v578_v24 = vrot.slane %v570_v23, %v3911_v48  ;;  %v594_v25 = vrot.slane %v586_v5, %v3911_v48 }
 0x242   :  { %v3976_v26 = vrot.slane %v898_v8, %v3908_v41  ;;  %v913_v27 = vrot.slane %v2943_v9, %v3908_v41  ;;  %v894_v28 = vcombine.low %v870_v18, %v886_v19  ;;  %v895_v29 = vcombine.high %v870_v18, %v886_v19 }
 0x243   :  { %v921_v30 = vrot.slane %v914_v12, %v3908_v41  ;;  %v929_v31 = vrot.slane %v2944_v13, %v3908_v41  ;;  %v526_v34 = vrot.slane %v518_v14, %v3911_v48  ;;  %v533_v35 = vrot.slane %v519_v15, %v3911_v48 }
 0x244   :  { %v1266_v36 = vpack.c.bf16 %v894_v28, %v894_v28  ;;  %v1267_v37 = vpack.c.bf16 %v895_v29, %v895_v29  ;;  %v863_v38 = vcombine.high %v837_v47, %v845_v49  ;;  %v879_v40 = vcombine.high %v853_v50, %v861_v51 }
 0x245   :  { %v606_v42 = vcombine.low %v510_v20, %v517_v21  ;;  %v2939_v43 = vcombine.high %v510_v20, %v517_v21  ;;  %v602_v44 = vcombine.low %v578_v24, %v594_v25  ;;  %v603_v45 = vcombine.high %v578_v24, %v594_v25 }
 0x246   :  { %v1280_v46 = vsel %vm1275_vm2, %v1266_v36, 0  ;;  %v1326_v22 = vsel %vm1275_vm2, %v1267_v37, 0  ;;  %v877_v52 = vrot.slane %v863_v38, %v3911_v48  ;;  %v893_v53 = vrot.slane %v879_v40, %v3911_v48 }
 0x247   :  { %v622_v54 = vcombine.low %v526_v34, %v533_v35  ;;  %v2940_v55 = vcombine.high %v526_v34, %v533_v35  ;;  %3069 = vmatpush3.bf16.xpose.msra.mxu1 %v1280_v46  ;;  %3075 = vmatpush3.bf16.xpose.msra.mxu0 %v1326_v22  ;;  %v930_v56 = vcombine.low %v3976_v26, %v913_v27 }
 0x248   :  { %3080 = vmatprep.subr.bf16.mxu1 %v3600_v0  ;;  %3086 = vmatprep.subr.bf16.mxu0 %v3600_v0  ;;  %v896_v47 = vcombine.low %v877_v52, %v893_v53  ;;  %v897_v49 = vcombine.high %v877_v52, %v893_v53  ;;  %v946_v50 = vcombine.low %v921_v30, %v929_v31  ;;  %v1274_v52 = vld [vmem:[#allocation2] sm:$0xff] }
 0x249   :  { %v938_v58 = vrot.slane %v930_v56, %v3911_v48  ;;  %v613_v60 = vrot.slane %v606_v42, %v3908_v41  ;;  %v621_v61 = vrot.slane %v2939_v43, %v3908_v41  ;;  %v1258_v62 = vpack.c.bf16 %v602_v44, %v602_v44 }
 0x24a   :  { %v1268_v51 = vpack.c.bf16 %v896_v47, %v896_v47  ;;  %v1269_v57 = vpack.c.bf16 %v897_v49, %v897_v49  ;;  %v954_v59 = vrot.slane %v946_v50, %v3911_v48  ;;  %v1259_v63 = vpack.c.bf16 %v603_v45, %v603_v45 }
 0x24b   :  { %v629_v1 = vrot.slane %v622_v54, %v3908_v41  ;;  %v637_v2 = vrot.slane %v2940_v55, %v3908_v41  ;;  %v585_v3 = vrot.slane %v571_v16, %v3911_v48  ;;  %v601_v4 = vrot.slane %v587_v17, %v3911_v48 }
 0x24c   :  { %v931_v23 = vcombine.high %v3976_v26, %v913_v27  ;;  %v947_v5 = vcombine.high %v921_v30, %v929_v31  ;;  %v1372_v6 = vsel %vm1275_vm2, %v1268_v51, 0  ;;  %v1418_v7 = vsel %vm1275_vm2, %v1269_v57, 0 }
 0x24d   :  { %v962_v8 = vcombine.low %v938_v58, %v954_v59  ;;  %v963_v9 = vcombine.high %v938_v58, %v954_v59  ;;  %v638_v10 = vcombine.low %v613_v60, %v621_v61  ;;  %v654_v11 = vcombine.low %v629_v1, %v637_v2 }
 0x24e   :  { %3071 = vmatmul.mubr.msk.bf16.vlgmr.msra.gmra.mrb[4].mxu1 %vm1275_vm2, %v1258_v62  ;;  %3077 = vmatmul.mubr.msk.bf16.vlgmr.msra.gmra.mrb[8].mxu0 %vm1275_vm2, %v1259_v63  ;;  %v604_v12 = vcombine.low %v585_v3, %v601_v4  ;;  %v605_v13 = vcombine.high %v585_v3, %v601_v4  ;;  %v945_v16 = vrot.slane %v931_v23, %v3911_v48 }
 0x24f   :  { %3081 = vmatpush3.bf16.xpose.msra.mxu1 %v1372_v6  ;;  %3087 = vmatpush3.bf16.xpose.msra.mxu0 %v1418_v7  ;;  %v1270_v14 = vpack.c.bf16 %v962_v8, %v962_v8  ;;  %v1271_v15 = vpack.c.bf16 %v963_v9, %v963_v9  ;;  %v961_v17 = vrot.slane %v947_v5, %v3911_v48 }
 0x250   :  { %3082 = vmatprep.mubr.msk.bf16.mxu1 %vm3601_vm0, %v3600_v0  ;;  %3088 = vmatprep.mubr.msk.bf16.mxu0 %vm3601_vm0, %v3600_v0  ;;  %v1260_v18 = vpack.c.bf16 %v604_v12, %v604_v12  ;;  %v1261_v19 = vpack.c.bf16 %v605_v13, %v605_v13  ;;  %v646_v20 = vrot.slane %v638_v10, %v3911_v48 }
 0x251   :  { %3092 = vmatprep.subr.bf16.mxu1 %v3600_v0  ;;  %3098 = vmatprep.subr.bf16.mxu0 %v3600_v0  ;;  %v662_v21 = vrot.slane %v654_v11, %v3911_v48  ;;  %v1464_v24 = vsel %vm1275_vm2, %v1270_v14, 0  ;;  %v1510_v25 = vsel %vm1275_vm2, %v1271_v15, 0  ;;  %v964_v26 = vcombine.low %v945_v16, %v961_v17 }
 0x252   :  { %v965_v27 = vcombine.high %v945_v16, %v961_v17  ;;  %v639_v28 = vcombine.high %v613_v60, %v621_v61  ;;  %v655_v29 = vcombine.high %v629_v1, %v637_v2 }
 0x253   :  { %v670_v30 = vcombine.low %v646_v20, %v662_v21  ;;  %v671_v31 = vcombine.high %v646_v20, %v662_v21  ;;  %v1272_v34 = vpack.c.bf16 %v964_v26, %v964_v26 }
 0x254   :  { %v1273_v35 = vpack.c.bf16 %v965_v27, %v965_v27  ;;  %v653_v38 = vrot.slane %v639_v28, %v3911_v48  ;;  %v669_v40 = vrot.slane %v655_v29, %v3911_v48 }
 0x255   :  { %v1262_v36 = vpack.c.bf16 %v670_v30, %v670_v30  ;;  %v1263_v37 = vpack.c.bf16 %v671_v31, %v671_v31  ;;  %v1556_v42 = vsel %vm1275_vm2, %v1272_v34, 0 }
 0x256   :  { %3083 = vmatmul.mubr.msk.bf16.vlgmr.msra.gmra.mrb[8].mxu1 %vm1275_vm2, %v1260_v18  ;;  %3089 = vmatmul.mubr.msk.bf16.vlgmr.msra.gmra.mrb[12].mxu0 %vm1275_vm2, %v1261_v19  ;;  %v1602_v43 = vsel %vm1275_vm2, %v1273_v35, 0  ;;  %v672_v44 = vcombine.low %v653_v38, %v669_v40  ;;  %v673_v45 = vcombine.high %v653_v38, %v669_v40 }
 0x257   :  { %3093 = vmatpush3.bf16.xpose.msra.mxu1 %v1464_v24  ;;  %3099 = vmatpush3.bf16.xpose.msra.mxu0 %v1510_v25 }
 0x258   :  { %3094 = vmatprep.mubr.msk.bf16.mxu1 %vm3601_vm0, %v3600_v0  ;;  %3100 = vmatprep.mubr.msk.bf16.mxu0 %vm3601_vm0, %v3600_v0  ;;  %v1264_v46 = vpack.c.bf16 %v672_v44, %v672_v44  ;;  %v1265_v22 = vpack.c.bf16 %v673_v45, %v673_v45 }
 0x259   :  { %3104 = vmatprep.subr.bf16.mxu1 %v3600_v0  ;;  %3110 = vmatprep.subr.bf16.mxu0 %v3600_v0 }
 0x25e   :  { %3095 = vmatmul.mubr.msk.bf16.vlgmr.msra.gmra.mrb[12].mxu1 %vm1275_vm2, %v1262_v36  ;;  %3101 = vmatmul.mubr.msk.bf16.vlgmr.msra.gmra.mrb[16].mxu0 %vm1275_vm2, %v1263_v37  ;;  %v969_v37 = vpop.permute.xlu1 %968 }
 0x25f   :  { %3105 = vmatpush3.bf16.xpose.msra.mxu1 %v1556_v42  ;;  %3111 = vmatpush3.bf16.xpose.msra.mxu0 %v1602_v43 }
 0x260   :  { %3106 = vmatprep.mubr.msk.bf16.mxu1 %vm3601_vm0, %v3600_v0  ;;  %3112 = vmatprep.mubr.msk.bf16.mxu0 %vm3601_vm0, %v3600_v0 }
 0x261   :  { %3116 = vmatprep.subr.bf16.mxu1 %v3600_v0  ;;  %3122 = vmatprep.subr.bf16.mxu0 %v3600_v0 }
 0x266   :  { %3107 = vmatmul.mubr.msk.bf16.vlgmr.msra.gmra.mrb[16].mxu1 %vm1275_vm2, %v1264_v46  ;;  %3113 = vmatmul.mubr.msk.bf16.vlgmr.msra.gmra.mrb[20].mxu0 %vm1275_vm2, %v1265_v22 }
 0x267   :  { %3118 = vmatprep.mubr.msk.bf16.mxu1 %vm3601_vm0, %v3600_v0  ;;  %3124 = vmatprep.mubr.msk.bf16.mxu0 %vm3601_vm0, %v3600_v0 }
 0x321   :  { %v1316_v53 = vpop.f32.mrb[4].mxu1  ;;  %v1362_v54 = vpop.f32.mrb[8].mxu0 }
 0x322   :  { %v1317_v55 = vadd.f32 %v1316_v53, %v1274_v52  ;;  %v1363_v56 = vadd.f32 %v1362_v54, %v1274_v52  ;;  %v3072_v47 = vpop.f32.mrb[5].mxu1  ;;  %v3078_v49 = vpop.f32.mrb[9].mxu0 }
 0x323   :  { %v1319_v50 = vpop.f32.mrb[6].mxu1  ;;  %v1365_v51 = vpop.f32.mrb[10].mxu0 }
 0x324   :  { %v3073_v57 = vpop.f32.mrb[7].mxu1  ;;  %v3079_v58 = vpop.f32.mrb[11].mxu0  ;;  %v1644_v59 = vsel %vm1275_vm2, %v1317_v55, -inf  ;;  %v1647_v60 = vsel %vm1275_vm2, %v1363_v56, -inf }
 0x325   :  { %1645 = vmax.xlane.f32.xlu0 %v1644_v59  ;;  %1648 = vmax.xlane.f32.xlu1 %v1647_v60 }
 0x329   :  { %v1408_v61 = vpop.f32.mrb[8].mxu1  ;;  %v1454_v62 = vpop.f32.mrb[12].mxu0 }
 0x32a   :  { %v1409_v63 = vadd.f32 %v1408_v61, %v1274_v52  ;;  %v3084_v1 = vpop.f32.mrb[9].mxu1  ;;  %v3090_v2 = vpop.f32.mrb[13].mxu0  ;;  %v1455_v23 = vadd.f32 %v1454_v62, %v1274_v52 }
 0x32b   :  { %v1411_v3 = vpop.f32.mrb[10].mxu1  ;;  %v1457_v4 = vpop.f32.mrb[14].mxu0 }
 0x32c   :  { %v3085_v5 = vpop.f32.mrb[11].mxu1  ;;  %v3091_v6 = vpop.f32.mrb[15].mxu0  ;;  %v1650_v7 = vsel %vm1275_vm2, %v1409_v63, -inf  ;;  %v1653_v8 = vsel %vm1275_vm2, %v1455_v23, -inf }
 0x32d   :  { %1651 = vmax.xlane.f32.xlu0 %v1650_v7 }
 0x331   :  { %v1500_v9 = vpop.f32.mrb[12].mxu1  ;;  %1654 = vmax.xlane.f32.xlu0 %v1653_v8  ;;  %v1546_v10 = vpop.f32.mrb[16].mxu0 }
 0x332   :  { %v1501_v11 = vadd.f32 %v1500_v9, %v1274_v52  ;;  %v4045_v12 = vadd.f32 %v1546_v10, %v1274_v52  ;;  %v3096_v13 = vpop.f32.mrb[13].mxu1  ;;  %v3102_v14 = vpop.f32.mrb[17].mxu0 }
 0x333   :  { %v1503_v15 = vpop.f32.mrb[14].mxu1  ;;  %v1549_v16 = vpop.f32.mrb[18].mxu0 }
 0x334   :  { %v3097_v17 = vpop.f32.mrb[15].mxu1  ;;  %v3103_v18 = vpop.f32.mrb[19].mxu0  ;;  %v1656_v19 = vsel %vm1275_vm2, %v1501_v11, -inf  ;;  %v1659_v20 = vsel %vm1275_vm2, %v4045_v12, -inf }
 0x335   :  { %1657 = vmax.xlane.f32.xlu1 %v1656_v19  ;;  %1660 = vmax.xlane.f32.xlu0 %v1659_v20 }
 0x339   :  { %v1592_v21 = vpop.f32.mrb[16].mxu1  ;;  %v1638_v24 = vpop.f32.mrb[20].mxu0 }
 0x33a   :  { %v4050_v25 = vadd.f32 %v1592_v21, %v1274_v52  ;;  %v4052_v26 = vadd.f32 %v1638_v24, %v1274_v52  ;;  %v3108_v27 = vpop.f32.mrb[17].mxu1  ;;  %v3114_v28 = vpop.f32.mrb[21].mxu0 }
 0x33b   :  { %v1595_v29 = vpop.f32.mrb[18].mxu1  ;;  %v1641_v30 = vpop.f32.mrb[22].mxu0 }
 0x33c   :  { %v3109_v31 = vpop.f32.mrb[19].mxu1  ;;  %v3115_v34 = vpop.f32.mrb[23].mxu0  ;;  %v1662_v35 = vsel %vm1275_vm2, %v4050_v25, -inf  ;;  %v1665_v36 = vsel %vm1275_vm2, %v4052_v26, -inf }
 0x33d   :  { %1663 = vmax.xlane.f32.xlu1 %v1662_v35  ;;  %1666 = vmax.xlane.f32.xlu0 %v1665_v36 }
 0x34e   :  { %980 = vrot.lane.b32.xlu1 %v3901_v33, %s3602_s0 }
 0x353   :  { %974 = vrot.lane.b32.xlu0 %v3901_v33, %s3604_s3 }
 0x3b2   :  { %v1646_v38 = vpop.xlane.xlu0 %1645  ;;  %v1649_v40 = vpop.xlane.xlu1 %1648 }
 0x3b3   :  { %v1668_v42 = vsub.f32 %v1317_v55, %v1646_v38  ;;  %v1669_v43 = vsub.f32 %v1363_v56, %v1649_v40 }
 0x3b5   :  { %v1676_v44 = vmul.f32 1.442695, %v1668_v42  ;;  %v1678_v45 = vmul.f32 1.442695, %v1669_v43 }
 0x3b7   :  { %3253 = vpow2.f32 %v1676_v44 }
 0x3b8   :  { %3255 = vpow2.f32 %v1678_v45 }
 0x3ba   :  { %v1652_v46 = vpop.xlane.xlu0 %1651 }
 0x3bb   :  { %v1670_v22 = vsub.f32 %v1409_v63, %v1652_v46 }
 0x3bd   :  { %v1680_v52 = vmul.f32 1.442695, %v1670_v22 }
 0x3be   :  { %v1655_v53 = vpop.xlane.xlu0 %1654 }
 0x3bf   :  { %3257 = vpow2.f32 %v1680_v52  ;;  %v1671_v54 = vsub.f32 %v1455_v23, %v1655_v53 }
 0x3c1   :  { %v4062_v47 = vpop.eup %3253  ;;  %v1682_v49 = vmul.f32 1.442695, %v1671_v54 }
 0x3c2   :  { %v4064_v50 = vpop.eup %3255  ;;  %v1658_v51 = vpop.xlane.xlu1 %1657  ;;  %v1692_v55 = vsel %vm1275_vm2, %v4062_v47, 0.0 }
 0x3c3   :  { %3259 = vpow2.f32 %v1682_v49  ;;  %v1672_v56 = vsub.f32 %v1501_v11, %v1658_v51  ;;  %1693 = vadd.xlane.f32.xlu1 %v1692_v55  ;;  %v1695_v57 = vsel %vm1275_vm2, %v4064_v50, 0.0  ;;  %v4070_v59 = vpop.xlane.xlu0 %1660 }
 0x3c4   :  { %1696 = vadd.xlane.f32.xlu0 %v1695_v57 }
 0x3c5   :  { %v1684_v58 = vmul.f32 1.442695, %v1672_v56  ;;  %v1673_v56 = vsub.f32 %v4045_v12, %v4070_v59 }
 0x3c7   :  { %3261 = vpow2.f32 %v1684_v58  ;;  %v1686_v57 = vmul.f32 1.442695, %v1673_v56 }
 0x3c9   :  { %v4072_v60 = vpop.eup %3257  ;;  %3263 = vpow2.f32 %v1686_v57 }
 0x3ca   :  { %v4074_v61 = vpop.xlane.xlu1 %1663  ;;  %v4076_v62 = vpop.xlane.xlu0 %1666  ;;  %v1698_v63 = vsel %vm1275_vm2, %v4072_v60, 0.0 }
 0x3cb   :  { %1699 = vadd.xlane.f32.xlu1 %v1698_v63  ;;  %v1674_v58 = vsub.f32 %v4050_v25, %v4074_v61  ;;  %v1675_v12 = vsub.f32 %v4052_v26, %v4076_v62 }
 0x3cd   :  { %v4080_v1 = vpop.eup %3259  ;;  %v1688_v63 = vmul.f32 1.442695, %v1674_v58  ;;  %v1690_v25 = vmul.f32 1.442695, %v1675_v12 }
 0x3ce   :  { %v981_v2 = vpop.permute.xlu1 %980  ;;  %v975_v3 = vpop.permute.xlu0 %974  ;;  %v1701_v4 = vsel %vm1275_vm2, %v4080_v1, 0.0 }
 0x3cf   :  { %v1002_v23 = vcombine.low %v969_v37, %v981_v2  ;;  %v1003_v5 = vcombine.high %v969_v37, %v981_v2  ;;  %v986_v6 = vcombine.low %v3901_v33, %v975_v3  ;;  %1702 = vadd.xlane.f32.xlu0 %v1701_v4  ;;  %v987_v7 = vcombine.high %v3901_v33, %v975_v3 }
 0x3d0   :  { %3265 = vpow2.f32 %v1688_v63 }
 0x3d1   :  { %v4086_v8 = vpop.eup %3261  ;;  %v1010_v9 = vrot.slane %v1002_v23, %v3908_v41  ;;  %v1017_v10 = vrot.slane %v1003_v5, %v3908_v41  ;;  %v994_v11 = vrot.slane %v986_v6, %v3908_v41  ;;  %v1001_v13 = vrot.slane %v987_v7, %v3908_v41 }
 0x3d2   :  { %v1704_v14 = vsel %vm1275_vm2, %v4086_v8, 0.0  ;;  %3267 = vpow2.f32 %v1690_v25 }
 0x3d3   :  { %v1018_v15 = vcombine.low %v994_v11, %v1010_v9  ;;  %v1019_v16 = vcombine.high %v994_v11, %v1010_v9  ;;  %1705 = vadd.xlane.f32.xlu0 %v1704_v14  ;;  %v1034_v17 = vcombine.low %v1001_v13, %v1017_v10  ;;  %v1035_v18 = vcombine.high %v1001_v13, %v1017_v10  ;;  %v4118_v2 = vpop.eup %3263 }
 0x3d4   :  { %v1707_v3 = vsel %vm1275_vm2, %v4118_v2, 0.0 }
 0x3d5   :  { %v1026_v33 = vrot.slane %v1018_v15, %v3911_v48  ;;  %v1033_v19 = vrot.slane %v1019_v16, %v3911_v48  ;;  %v1042_v20 = vrot.slane %v1034_v17, %v3911_v48  ;;  %v1049_v21 = vrot.slane %v1035_v18, %v3911_v48 }
 0x3d7   :  { %v1122_v24 = vcombine.low %v1026_v33, %v1033_v19  ;;  %v2945_v27 = vcombine.high %v1026_v33, %v1033_v19  ;;  %v1138_v28 = vcombine.low %v1042_v20, %v1049_v21  ;;  %v2946_v29 = vcombine.high %v1042_v20, %v1049_v21 }
 0x3d9   :  { %v1129_v30 = vrot.slane %v1122_v24, %v3908_v41  ;;  %v1137_v31 = vrot.slane %v2945_v27, %v3908_v41  ;;  %v1145_v34 = vrot.slane %v1138_v28, %v3908_v41  ;;  %v1153_v35 = vrot.slane %v2946_v29, %v3908_v41 }
 0x3da   :  { %v4122_v4 = vpop.eup %3265 }
 0x3db   :  { %v1154_v36 = vcombine.low %v1129_v30, %v1137_v31  ;;  %v1155_v37 = vcombine.high %v1129_v30, %v1137_v31  ;;  %v1170_v38 = vcombine.low %v1145_v34, %v1153_v35  ;;  %v1171_v40 = vcombine.high %v1145_v34, %v1153_v35 }
 0x3dc   :  { %976 = vrot.lane.b32.xlu1 %v3905_v39, %s3604_s3  ;;  %v1710_v23 = vsel %vm1275_vm2, %v4122_v4, 0.0  ;;  %v4130_v59 = vpop.eup %3267 }
 0x3dd   :  { %v1162_v42 = vrot.slane %v1154_v36, %v3911_v48  ;;  %v1169_v43 = vrot.slane %v1155_v37, %v3911_v48  ;;  %v1178_v44 = vrot.slane %v1170_v38, %v3911_v48  ;;  %v1185_v45 = vrot.slane %v1171_v40, %v3911_v48 }
 0x3de   :  { %v1713_v61 = vsel %vm1275_vm2, %v4130_v59, 0.0 }
 0x3df   :  { %v1186_v46 = vcombine.low %v1162_v42, %v1178_v44  ;;  %v1187_v22 = vcombine.high %v1162_v42, %v1178_v44  ;;  %v1188_v52 = vcombine.low %v1169_v43, %v1185_v45  ;;  %v1189_v53 = vcombine.high %v1169_v43, %v1185_v45 }
 0x3e1   :  { %v1749_v54 = vpack.c.bf16 %v1186_v46, %v1186_v46  ;;  %v1750_v49 = vpack.c.bf16 %v1187_v22, %v1187_v22  ;;  %v1751_v26 = vpack.c.bf16 %v1188_v52, %v1188_v52  ;;  %v1752_v14 = vpack.c.bf16 %v1189_v53, %v1189_v53 }
 0x3e3   :  { %v1762_v51 = vsel %vm1760_vm3, %v1749_v54, 0  ;;  %v1808_v55 = vsel %vm1760_vm3, %v1750_v49, 0  ;;  %v1854_v17 = vsel %vm1760_vm3, %v1751_v26, 0 }
 0x3e4   :  { %3117 = vmatpush3.bf16.msra.mxu1 %v1762_v51  ;;  %3123 = vmatpush3.bf16.msra.mxu0 %v1808_v55 }
 0x3e5   :  { %3128 = vmatprep.subr.bf16.mxu1 %v3600_v0  ;;  %3134 = vmatprep.subr.bf16.mxu0 %v3600_v0 }
 0x3e9   :  { %970 = vrot.lane.b32.xlu0 %v3905_v39, %s3603_s27 }
 0x400   :  { %1708 = vadd.xlane.f32.xlu1 %v1707_v3 }
 0x408   :  { %1711 = vadd.xlane.f32.xlu0 %v1710_v23 }
 0x411   :  { %982 = vrot.lane.b32.xlu1 %v3905_v39, %s3602_s0  ;;  %s3613_s0 = smov [#allocation17]  }
 0x412   :  { %s2878_s27 = sshll.u32 %s3613_s0, 4  ;;  %s4345_s27 = int_to_ptr.vmem [resolvable:$true] %s2878_s27 }
 0x435   :  { %1714 = vadd.xlane.f32.xlu1 %v1713_v61 }
 0x450   :  { %v1694_v5 = vpop.xlane.xlu1 %1693 }
 0x451   :  { %3269 = vrcp.f32 %v1694_v5  ;;  %v1697_v6 = vpop.xlane.xlu0 %1696 }
 0x452   :  { %3271 = vrcp.f32 %v1697_v6 }
 0x458   :  { %v1700_v7 = vpop.xlane.xlu1 %1699 }
 0x459   :  { %3273 = vrcp.f32 %v1700_v7 }
 0x45b   :  { %v3270_v9 = vpop.eup %3269 }
 0x45c   :  { %v3272_v10 = vpop.eup %3271  ;;  %v1717_v11 = vmul.f32 %v3270_v9, %v4062_v47  ;;  %v1703_v13 = vpop.xlane.xlu0 %1702  ;;  %v1900_v47 = vsel %vm1760_vm3, %v1752_v14, 0 }
 0x45d   :  { %v1719_v62 = vmul.f32 %v3272_v10, %v4064_v50  ;;  %3275 = vrcp.f32 %v1703_v13 }
 0x45e   :  { %v1732_v15 = vpack.c.bf16 %v1717_v11, %v1717_v11 }
 0x45f   :  { %v1733_v16 = vpack.c.bf16 %v1719_v62, %v1719_v62 }
 0x460   :  { %1741 = vst.msk [vmem:[#allocation20] sm:$0xf] %vm1740_vm4, %v1732_v15  ;;  %3119 = vmatmul.mubr.msk.bf16.vlgmr.msra.gmra.mrb[20].mxu1 %vm1275_vm2, %v1732_v15  ;;  %v1706_v18 = vpop.xlane.xlu0 %1705 }
 0x461   :  { %1742 = vst.msk [vmem:[#allocation20 + $0x4] sm:$0xf] %vm1740_vm4, %v1733_v16  ;;  %3125 = vmatmul.mubr.msk.bf16.vlgmr.msra.gmra.mrb[24].mxu0 %vm1275_vm2, %v1733_v16  ;;  %3129 = vmatpush3.bf16.msra.mxu1 %v1854_v17  ;;  %3277 = vrcp.f32 %v1706_v18 }
 0x462   :  { %3135 = vmatpush3.bf16.msra.mxu0 %v1900_v47  ;;  %3130 = vmatprep.mubr.msk.bf16.mxu1 %vm3601_vm0, %v3600_v0 }
 0x463   :  { %v3274_v50 = vpop.eup %3273  ;;  %3136 = vmatprep.mubr.msk.bf16.mxu0 %vm3601_vm0, %v3600_v0  ;;  %3140 = vmatprep.subr.bf16.mxu1 %v3600_v0 }
 0x464   :  { %v1721_v33 = vmul.f32 %v3274_v50, %v4072_v60  ;;  %3146 = vmatprep.subr.bf16.mxu0 %v3600_v0 }
 0x466   :  { %v1734_v19 = vpack.c.bf16 %v1721_v33, %v1721_v33 }
 0x467   :  { %v3276_v20 = vpop.eup %3275 }
 0x468   :  { %v1723_v21 = vmul.f32 %v3276_v20, %v4080_v1  ;;  %1743 = vst.msk [vmem:[#allocation20 + $0x8] sm:$0xf] %vm1740_vm4, %v1734_v19  ;;  %3131 = vmatmul.mubr.msk.bf16.vlgmr.msra.gmra.mrb[24].mxu1 %vm1275_vm2, %v1734_v19  ;;  %v977_v1 = vpop.permute.xlu1 %976 }
 0x469   :  { %3142 = vmatprep.mubr.msk.bf16.mxu1 %vm3601_vm0, %v3600_v0  ;;  %v1054_v30 = vcombine.low %v3905_v39, %v977_v1  ;;  %v1055_v31 = vcombine.high %v3905_v39, %v977_v1 }
 0x46a   :  { %v1735_v24 = vpack.c.bf16 %v1723_v21, %v1723_v21 }
 0x46b   :  { %v3278_v27 = vpop.eup %3277  ;;  %v1062_v37 = vrot.slane %v1054_v30, %v3908_v41  ;;  %v1069_v38 = vrot.slane %v1055_v31, %v3908_v41 }
 0x46c   :  { %v1725_v28 = vmul.f32 %v3278_v27, %v4086_v8  ;;  %1744 = vst.msk [vmem:[#allocation20 + $0xc] sm:$0xf] %vm1740_vm4, %v1735_v24  ;;  %3137 = vmatmul.mubr.msk.bf16.vlgmr.msra.gmra.mrb[28].mxu0 %vm1275_vm2, %v1735_v24  ;;  %v971_v8 = vpop.permute.xlu0 %970 }
 0x46d   :  { %3148 = vmatprep.mubr.msk.bf16.mxu0 %vm3601_vm0, %v3600_v0 }
 0x46e   :  { %v4159_v60 = vpack.c.bf16 %v1725_v28, %v1725_v28 }
 0x470   :  { %1745 = vst.msk [vmem:[#allocation20 + $0x10] sm:$0xf] %vm1740_vm4, %v4159_v60 }
 0x48d   :  { %v1709_v29 = vpop.xlane.xlu1 %1708 }
 0x48e   :  { %3279 = vrcp.f32 %v1709_v29 }
 0x491   :  { %v983_v34 = vpop.permute.xlu1 %982 }
 0x492   :  { %v1070_v35 = vcombine.low %v971_v8, %v983_v34  ;;  %v1071_v36 = vcombine.high %v971_v8, %v983_v34 }
 0x494   :  { %v1078_v40 = vrot.slane %v1070_v35, %v3908_v41  ;;  %v1085_v42 = vrot.slane %v1071_v36, %v3908_v41 }
 0x495   :  { %v1712_v43 = vpop.xlane.xlu0 %1711 }
 0x496   :  { %v1086_v44 = vcombine.low %v1062_v37, %v1078_v40  ;;  %v1087_v45 = vcombine.high %v1062_v37, %v1078_v40  ;;  %v1102_v46 = vcombine.low %v1069_v38, %v1085_v42  ;;  %v1103_v22 = vcombine.high %v1069_v38, %v1085_v42 }
 0x497   :  { %3281 = vrcp.f32 %v1712_v43 }
 0x498   :  { %v3280_v52 = vpop.eup %3279  ;;  %v1094_v39 = vrot.slane %v1086_v44, %v3911_v48  ;;  %v1101_v53 = vrot.slane %v1087_v45, %v3911_v48  ;;  %v1110_v54 = vrot.slane %v1102_v46, %v3911_v48  ;;  %v1117_v49 = vrot.slane %v1103_v22, %v3911_v48 }
 0x499   :  { %v1727_v51 = vmul.f32 %v3280_v52, %v4118_v2 }
 0x49a   :  { %v1190_v55 = vcombine.low %v1094_v39, %v1101_v53  ;;  %v2947_v56 = vcombine.high %v1094_v39, %v1101_v53  ;;  %v1206_v57 = vcombine.low %v1110_v54, %v1117_v49  ;;  %v2948_v58 = vcombine.high %v1110_v54, %v1117_v49 }
 0x49b   :  { %v1737_v63 = vpack.c.bf16 %v1727_v51, %v1727_v51 }
 0x49c   :  { %v1197_v3 = vrot.slane %v1190_v55, %v3908_v41  ;;  %v1205_v23 = vrot.slane %v2947_v56, %v3908_v41  ;;  %v1213_v12 = vrot.slane %v1206_v57, %v3908_v41  ;;  %v1221_v25 = vrot.slane %v2948_v58, %v3908_v41 }
 0x49d   :  { %1746 = vst.msk [vmem:[#allocation20 + $0x14] sm:$0xf] %vm1740_vm4, %v1737_v63 }
 0x49e   :  { %v1222_v61 = vcombine.low %v1197_v3, %v1205_v23  ;;  %v1238_v5 = vcombine.low %v1213_v12, %v1221_v25  ;;  %v1223_v6 = vcombine.high %v1197_v3, %v1205_v23  ;;  %v1239_v7 = vcombine.high %v1213_v12, %v1221_v25 }
 0x4a0   :  { %v1230_v2 = vrot.slane %v1222_v61, %v3911_v48  ;;  %v1246_v9 = vrot.slane %v1238_v5, %v3911_v48  ;;  %v1237_v10 = vrot.slane %v1223_v6, %v3911_v48  ;;  %v1253_v11 = vrot.slane %v1239_v7, %v3911_v48 }
 0x4a1   :  { %v3282_v13 = vpop.eup %3281 }
 0x4a2   :  { %v1729_v26 = vmul.f32 %v3282_v13, %v4122_v4  ;;  %v1254_v62 = vcombine.low %v1230_v2, %v1246_v9  ;;  %v1255_v14 = vcombine.high %v1230_v2, %v1246_v9  ;;  %v1256_v15 = vcombine.low %v1237_v10, %v1253_v11 }
 0x4a3   :  { %v1257_v16 = vcombine.high %v1237_v10, %v1253_v11 }
 0x4a4   :  { %v1753_v17 = vpack.c.bf16 %v1254_v62, %v1254_v62  ;;  %v1754_v18 = vpack.c.bf16 %v1255_v14, %v1255_v14  ;;  %v1738_v47 = vpack.c.bf16 %v1729_v26, %v1729_v26  ;;  %v1755_v19 = vpack.c.bf16 %v1256_v15, %v1256_v15 }
 0x4a5   :  { %v1756_v20 = vpack.c.bf16 %v1257_v16, %v1257_v16 }
 0x4a6   :  { %v1946_v50 = vsel %vm1760_vm3, %v1753_v17, 0  ;;  %v1992_v33 = vsel %vm1760_vm3, %v1754_v18, 0  ;;  %1747 = vst.msk [vmem:[#allocation20 + $0x18] sm:$0xf] %vm1740_vm4, %v1738_v47  ;;  %v2038_v4 = vsel %vm1760_vm3, %v1755_v19, 0 }
 0x4a7   :  { %3141 = vmatpush3.bf16.msra.mxu1 %v1946_v50  ;;  %3147 = vmatpush3.bf16.msra.mxu0 %v1992_v33  ;;  %v2084_v21 = vsel %vm1760_vm3, %v1756_v20, 0 }
 0x4a8   :  { %3152 = vmatprep.subr.bf16.mxu1 %v3600_v0  ;;  %3158 = vmatprep.subr.bf16.mxu0 %v3600_v0 }
 0x4aa   :  { %3143 = vmatmul.mubr.msk.bf16.vlgmr.msra.gmra.mrb[28].mxu1 %vm1275_vm2, %v4159_v60  ;;  %3149 = vmatmul.mubr.msk.bf16.vlgmr.msra.gmra.mrb[32].mxu0 %vm1275_vm2, %v1737_v63 }
 0x4ab   :  { %3153 = vmatpush3.bf16.msra.mxu1 %v2038_v4  ;;  %3159 = vmatpush3.bf16.msra.mxu0 %v2084_v21 }
 0x4ac   :  { %3154 = vmatprep.mubr.msk.bf16.mxu1 %vm3601_vm0, %v3600_v0  ;;  %3160 = vmatprep.mubr.msk.bf16.mxu0 %vm3601_vm0, %v3600_v0 }
 0x4ad   :  { %3164 = vmatprep.subr.bf16.mxu1 %v3600_v0  ;;  %3172 = vmatprep.subr.bf16.mxu0 %v3600_v0 }
 0x4b2   :  { %3155 = vmatmul.mubr.msk.bf16.vlgmr.msra.gmra.mrb[32].mxu1 %vm1275_vm2, %v1738_v47 }
 0x4b3   :  { %3168 = vmatprep.mubr.msk.bf16.mxu1 %vm3601_vm0, %v3600_v0 }
 0x4c2   :  { %v1715_v24 = vpop.xlane.xlu1 %1714 }
 0x4c3   :  { %3283 = vrcp.f32 %v1715_v24 }
 0x4cd   :  { %v3284_v27 = vpop.eup %3283 }
 0x4ce   :  { %v1731_v28 = vmul.f32 %v3284_v27, %v4130_v59 }
 0x4d0   :  { %v1739_v60 = vpack.c.bf16 %v1731_v28, %v1731_v28 }
 0x4d2   :  { %1748 = vst.msk [vmem:[#allocation20 + $0x1c] sm:$0xf] %vm1740_vm4, %v1739_v60  ;;  %3161 = vmatmul.mubr.msk.bf16.vlgmr.msra.gmra.mrb[36].mxu0 %vm1275_vm2, %v1739_v60 }
 0x4d3   :  { %3176 = vmatprep.mubr.msk.bf16.mxu0 %vm3601_vm0, %v3600_v0 }
 0x533   :  { %v1798_v1 = vpop.f32.mrb[20].mxu1 }
 0x534   :  { %v1844_v29 = vpop.f32.mrb[24].mxu0  ;;  %v3120_v30 = vpop.f32.mrb[21].mxu1 }
 0x535   :  { %v3126_v31 = vpop.f32.mrb[25].mxu0  ;;  %v1801_v8 = vpop.f32.mrb[22].mxu1 }
 0x536   :  { %v1847_v34 = vpop.f32.mrb[26].mxu0  ;;  %v3121_v35 = vpop.f32.mrb[23].mxu1 }
 0x537   :  { %v3127_v36 = vpop.f32.mrb[27].mxu0 }
 0x53b   :  { %v1890_v37 = vpop.f32.mrb[24].mxu1 }
 0x53c   :  { %v2126_v38 = vcombine.low %v1798_v1, %v1890_v37  ;;  %v2127_v40 = vcombine.high %v1798_v1, %v1890_v37  ;;  %v3132_v59 = vpop.f32.mrb[25].mxu1 }
 0x53d   :  { %v1893_v42 = vpop.f32.mrb[26].mxu1 }
 0x53e   :  { %v3133_v43 = vpop.f32.mrb[27].mxu1  ;;  %v2134_v39 = vrot.slane %v2126_v38, %v3908_v41  ;;  %v2141_v53 = vrot.slane %v2127_v40, %v3908_v41 }
 0x53f   :  { %v1936_v44 = vpop.f32.mrb[28].mxu0 }
 0x540   :  { %v2142_v45 = vcombine.low %v1844_v29, %v1936_v44  ;;  %v2143_v46 = vcombine.high %v1844_v29, %v1936_v44  ;;  %v3138_v22 = vpop.f32.mrb[29].mxu0 }
 0x541   :  { %v1939_v52 = vpop.f32.mrb[30].mxu0 }
 0x542   :  { %v2150_v54 = vrot.slane %v2142_v45, %v3908_v41  ;;  %v2157_v49 = vrot.slane %v2143_v46, %v3908_v41  ;;  %v3139_v51 = vpop.f32.mrb[31].mxu0 }
 0x544   :  { %v2158_v55 = vcombine.low %v2134_v39, %v2150_v54  ;;  %v2159_v56 = vcombine.high %v2134_v39, %v2150_v54  ;;  %v2174_v57 = vcombine.low %v2141_v53, %v2157_v49  ;;  %v2175_v58 = vcombine.high %v2141_v53, %v2157_v49 }
 0x546   :  { %v2166_v63 = vrot.slane %v2158_v55, %v3911_v48  ;;  %v2173_v3 = vrot.slane %v2159_v56, %v3911_v48  ;;  %v2182_v23 = vrot.slane %v2174_v57, %v3911_v48  ;;  %v2189_v12 = vrot.slane %v2175_v58, %v3911_v48 }
 0x548   :  { %v2262_v25 = vcombine.low %v2166_v63, %v2173_v3  ;;  %v2965_v61 = vcombine.high %v2166_v63, %v2173_v3  ;;  %v2278_v5 = vcombine.low %v2182_v23, %v2189_v12  ;;  %v2966_v6 = vcombine.high %v2182_v23, %v2189_v12  ;;  %v3239_v63 = vld [vmem:[#allocation14] sm:$0xff]  }
 0x549   :  { %3165 = vmatpush3.bf16.msra.mxu1 %v3239_v63  ;;  %v3243_v63 = vld [vmem:[%s4417_s14] sm:$0xff]  }
 0x54a   :  { %v2269_v7 = vrot.slane %v2262_v25, %v3908_v41  ;;  %v2277_v2 = vrot.slane %v2965_v61, %v3908_v41  ;;  %v2285_v9 = vrot.slane %v2278_v5, %v3908_v41  ;;  %v2293_v10 = vrot.slane %v2966_v6, %v3908_v41  ;;  %3166 = vmatprep.subr.bf16.mxu1 %v3600_v0 }
 0x54c   :  { %v2295_v11 = vcombine.high %v2269_v7, %v2277_v2  ;;  %v2311_v13 = vcombine.high %v2285_v9, %v2293_v10  ;;  %v2294_v26 = vcombine.low %v2269_v7, %v2277_v2  ;;  %v2310_v62 = vcombine.low %v2285_v9, %v2293_v10 }
 0x54e   :  { %v4221_v14 = vrot.slane %v2295_v11, %v3911_v48  ;;  %v4224_v15 = vrot.slane %v2311_v13, %v3911_v48  ;;  %v4227_v16 = vrot.slane %v2294_v26, %v3911_v48  ;;  %v4230_v17 = vrot.slane %v2310_v62, %v3911_v48  ;;  %v3240_v13 = vld [vmem:[#allocation14 + $0x8] sm:$0xff]  }
 0x54f   :  { %3167 = vmatpush3.bf16.msra.mxu1 %v3240_v13 }
 0x550   :  { %v2328_v18 = vcombine.low %v4221_v14, %v4224_v15  ;;  %v2326_v47 = vcombine.low %v4227_v16, %v4230_v17  ;;  %v2327_v50 = vcombine.high %v4227_v16, %v4230_v17  ;;  %v2329_v33 = vcombine.high %v4221_v14, %v4224_v15  ;;  %3180 = vmatprep.subr.bf16.mxu1 %v3600_v0  ;;  %v2969_v16 = vld [vmem:[#allocation16] ss:$0 sm:$0xff] }
 0x57d   :  { %v1982_v19 = vpop.f32.mrb[28].mxu1  ;;  %v2028_v20 = vpop.f32.mrb[32].mxu0 }
 0x57e   :  { %v3144_v4 = vpop.f32.mrb[29].mxu1  ;;  %v3150_v21 = vpop.f32.mrb[33].mxu0 }
 0x57f   :  { %v1985_v24 = vpop.f32.mrb[30].mxu1  ;;  %v2031_v27 = vpop.f32.mrb[34].mxu0 }
 0x580   :  { %v3145_v28 = vpop.f32.mrb[31].mxu1  ;;  %v3151_v60 = vpop.f32.mrb[35].mxu0 }
 0x585   :  { %v2074_v1 = vpop.f32.mrb[32].mxu1 }
 0x586   :  { %v2194_v29 = vcombine.low %v1982_v19, %v2074_v1  ;;  %v2195_v30 = vcombine.high %v1982_v19, %v2074_v1  ;;  %v3156_v31 = vpop.f32.mrb[33].mxu1 }
 0x587   :  { %v2077_v8 = vpop.f32.mrb[34].mxu1 }
 0x588   :  { %v3157_v34 = vpop.f32.mrb[35].mxu1  ;;  %v2202_v59 = vrot.slane %v2194_v29, %v3908_v41  ;;  %v2209_v42 = vrot.slane %v2195_v30, %v3908_v41 }
 0x5a5   :  { %v2120_v35 = vpop.f32.mrb[36].mxu0 }
 0x5a6   :  { %v2210_v36 = vcombine.low %v2028_v20, %v2120_v35  ;;  %v2211_v37 = vcombine.high %v2028_v20, %v2120_v35  ;;  %v3162_v38 = vpop.f32.mrb[37].mxu0 }
 0x5a7   :  { %v2123_v40 = vpop.f32.mrb[38].mxu0 }
 0x5a8   :  { %v2218_v43 = vrot.slane %v2210_v36, %v3908_v41  ;;  %v2225_v44 = vrot.slane %v2211_v37, %v3908_v41  ;;  %v3163_v45 = vpop.f32.mrb[39].mxu0  ;;  %v3309_v40 = vld [vmem:[%s4452_s20] sm:$0xff] }
 0x5aa   :  { %v2226_v46 = vcombine.low %v2202_v59, %v2218_v43  ;;  %v2227_v22 = vcombine.high %v2202_v59, %v2218_v43  ;;  %v2242_v52 = vcombine.low %v2209_v42, %v2225_v44  ;;  %v2243_v39 = vcombine.high %v2209_v42, %v2225_v44  ;;  %v3310_v43 = vld [vmem:[%s4452_s20 + $0x8] sm:$0xff] }
 0x5ac   :  { %v2234_v53 = vrot.slane %v2226_v46, %v3911_v48  ;;  %v2241_v54 = vrot.slane %v2227_v22, %v3911_v48  ;;  %v2250_v49 = vrot.slane %v2242_v52, %v3911_v48  ;;  %v2257_v51 = vrot.slane %v2243_v39, %v3911_v48 }
 0x5ae   :  { %v2330_v55 = vcombine.low %v2234_v53, %v2241_v54  ;;  %v2967_v56 = vcombine.high %v2234_v53, %v2241_v54  ;;  %v2346_v57 = vcombine.low %v2250_v49, %v2257_v51  ;;  %v2968_v58 = vcombine.high %v2250_v49, %v2257_v51 }
 0x5b0   :  { %v2337_v3 = vrot.slane %v2330_v55, %v3908_v41  ;;  %v2345_v23 = vrot.slane %v2967_v56, %v3908_v41  ;;  %v2353_v12 = vrot.slane %v2346_v57, %v3908_v41  ;;  %v2361_v25 = vrot.slane %v2968_v58, %v3908_v41  ;;  %v3241_v57 = vld [vmem:[%s4415_s12] sm:$0xff]   ;;  %v3242_v58 = vld [vmem:[%s4415_s12 + $0x8] sm:$0xff]  }
 0x5b1   :  { %3173 = vmatpush3.bf16.msra.mxu0 %v3241_v57 }
 0x5b2   :  { %v2363_v61 = vcombine.high %v2337_v3, %v2345_v23  ;;  %v2379_v5 = vcombine.high %v2353_v12, %v2361_v25  ;;  %v2362_v6 = vcombine.low %v2337_v3, %v2345_v23  ;;  %v2378_v7 = vcombine.low %v2353_v12, %v2361_v25  ;;  %3174 = vmatprep.subr.bf16.mxu0 %v3600_v0  ;;  %v3244_v3 = vld [vmem:[%s4417_s14 + $0x8] sm:$0xff]  }
 0x5b4   :  { %v2377_v2 = vrot.slane %v2363_v61, %v3911_v48  ;;  %v2393_v9 = vrot.slane %v2379_v5, %v3911_v48  ;;  %v2370_v10 = vrot.slane %v2362_v6, %v3911_v48  ;;  %v2386_v11 = vrot.slane %v2378_v7, %v3911_v48 }
 0x5b5   :  { %3175 = vmatpush3.bf16.msra.mxu0 %v3242_v58 }
 0x5b6   :  { %v2396_v26 = vcombine.low %v2377_v2, %v2393_v9  ;;  %v2395_v62 = vcombine.high %v2370_v10, %v2386_v11  ;;  %v2394_v14 = vcombine.low %v2370_v10, %v2386_v11  ;;  %v2397_v41 = vcombine.high %v2377_v2, %v2393_v9  ;;  %v2973_v2 = vld [vmem:[%s4413_s10] ss:$0 sm:$0xff] }
 0x5b8   :  { %v3223_v15 = vpack.i.bf16 %v2396_v26, %v2328_v18  ;;  %v3218_v19 = vpack.i.bf16 %v2395_v62, %v2327_v50  ;;  %v3228_v20 = vpack.i.bf16 %v2397_v41, %v2329_v33  ;;  %v2974_v26 = vld [vmem:[%s4414_s11] ss:$0 sm:$0xff] }
 0x5ba   :  { %3224 = vrot.lane.b32.xlu1 %v3223_v15, %s3607_s1  ;;  %3219 = vrot.lane.b32.xlu0 %v3218_v19, %s3608_s5  ;;  %v3245_v19 = vld [vmem:[%s4417_s14 + $0x10] sm:$0xff]  }
 0x5be   :  { %3229 = vrot.lane.b32.xlu0 %v3228_v20, %s3609_s2  ;;  %v3246_v20 = vld [vmem:[%s4417_s14 + $0x18] sm:$0xff]  }
 0x62c   :  { %v3225_v4 = vpop.permute.xlu1 %3224  ;;  %v3220_v48 = vpop.permute.xlu0 %3219 }
 0x62d   :  { %v3222_v21 = vunpack.i.h.bf16 %v3220_v48  ;;  %v3221_v24 = vunpack.i.l.bf16 %v3220_v48  ;;  %v3227_v27 = vunpack.i.h.bf16 %v3225_v4  ;;  %v3226_v28 = vunpack.i.l.bf16 %v3225_v4  ;;  %v2975_v4 = vld [vmem:[%s4416_s13] ss:$0 sm:$0xff] }
 0x62f   :  { %v2422_v18 = vsel %vm1275_vm2, %v2326_v47, %v3221_v24  ;;  %v2423_v50 = vsel %vm1275_vm2, %v2394_v14, %v3222_v21 }
 0x630   :  { %v3230_v33 = vpop.permute.xlu0 %3229  ;;  %v2425_v29 = vsel %vm2424_vm5, %v2422_v18, %v3226_v28  ;;  %v2426_v30 = vsel %vm2424_vm5, %v2423_v50, %v3227_v27 }
 0x631   :  { %v3232_v60 = vunpack.i.h.bf16 %v3230_v33  ;;  %v3231_v1 = vunpack.i.l.bf16 %v3230_v33 }
 0x633   :  { %v2428_v31 = vsel %vm2427_vm6, %v2425_v29, %v3231_v1  ;;  %v2429_v8 = vsel %vm2427_vm6, %v2426_v30, %v3232_v60 }
 0x634   :  { %v2434_v34 = vpack.c.bf16 %v2429_v8, %v2428_v31 }
 0x636   :  { %3169 = vmatmul.mubr.msk.bf16.vlgmr.msra.gmra.mrb[36].mxu1 %vm209_vm1, %v2434_v34 }
 0x637   :  { %3188 = vmatprep.mubr.msk.bf16.mxu1 %vm3601_vm0, %v3600_v0  ;;  %3181 = vmatpush3.bf16.msra.mxu1 %v3243_v63 }
 0x638   :  { %3182 = vmatprep.subr.bf16.mxu1 %v3600_v0 }
 0x63b   :  { %3183 = vmatpush3.bf16.msra.mxu1 %v3244_v3  ;;  %v2985_v3 = vld [vmem:[%s4419_s16] ss:$0 sm:$0xff]  ;;  %s3611_s16 = smov [#allocation18]  }
 0x63c   :  { %3184 = vmatprep.subr.bf16.mxu1 %v3600_v0 }
 0x63f   :  { %3185 = vmatpush3.bf16.msra.mxu1 %v3245_v19 }
 0x640   :  { %3186 = vmatprep.subr.bf16.mxu1 %v3600_v0  ;;  %v2979_v0 = vld [vmem:[%s4418_s15] ss:$0 sm:$0xff] }
 0x643   :  { %3187 = vmatpush3.bf16.msra.mxu1 %v3246_v20 }
 0x709   :  { %v2491_v17 = vpop.f32.mrb[36].mxu1 }
 0x70a   :  { %v2492_v47 = vadd.f32 %v2969_v16, %v2491_v17  ;;  %v3170_v35 = vpop.f32.mrb[37].mxu1 }
 0x70b   :  { %v2494_v36 = vpop.f32.mrb[38].mxu1 }
 0x70c   :  { %v2495_v37 = vadd.f32 %v2969_v16, %v2494_v36  ;;  %v3171_v38 = vpop.f32.mrb[39].mxu1  ;;  %v2498_v59 = vadd.f32 %v3309_v40, %v2492_v47 }
 0x70e   :  { %v2502_v42 = vsel %vm209_vm1, %v2498_v59, 0.0  ;;  %v2499_v44 = vadd.f32 %v3310_v43, %v2495_v37 }
 0x70f   :  { %2503 = vadd.xlane.f32.xlu1 %v2502_v42 }
 0x710   :  { %v2505_v45 = vsel %vm209_vm1, %v2499_v44, 0.0 }
 0x711   :  { %2506 = vadd.xlane.f32.xlu0 %v2505_v45 }
 0x79c   :  { %v2504_v46 = vpop.xlane.xlu1 %2503 }
 0x79d   :  { %v2509_v22 = vmul.f32 0.03125, %v2504_v46 }
 0x79e   :  { %v2507_v52 = vpop.xlane.xlu0 %2506 }
 0x79f   :  { %v2511_v39 = vsub.f32 %v2498_v59, %v2509_v22  ;;  %v2510_v53 = vmul.f32 0.03125, %v2507_v52  ;;  %v3247_v22 = vld [vmem:[%s4421_s18] ss:$8 sps:$4 sm:$0xff]   ;;  %v3249_v52 = vld [vmem:[%s4421_s18 + $0x4] ss:$8 sps:$4 sm:$0xff]  }
 0x7a0   :  { %2786 = vmatprep.subr.bf16.mxu0 %v3249_v52 }
 0x7a1   :  { %v2512_v54 = vsub.f32 %v2499_v44, %v2510_v53  ;;  %v2513_v49 = vmul.f32 %v2511_v39, %v2511_v39  ;;  %v3610_v53 = vmov 0  }
 0x7a3   :  { %v2515_v51 = vsel %vm209_vm1, %v2513_v49, 0.0  ;;  %v2514_v55 = vmul.f32 %v2512_v54, %v2512_v54 }
 0x7a4   :  { %2516 = vadd.xlane.f32.xlu0 %v2515_v51 }
 0x7a5   :  { %v2518_v56 = vsel %vm209_vm1, %v2514_v55, 0.0 }
 0x7a6   :  { %2519 = vadd.xlane.f32.xlu1 %v2518_v56 }
 0x831   :  { %v2517_v23 = vpop.xlane.xlu0 %2516 }
 0x832   :  { %v2521_v12 = vmul.f32 0.03125, %v2517_v23 }
 0x833   :  { %v2520_v25 = vpop.xlane.xlu1 %2519 }
 0x834   :  { %v2523_v61 = vadd.f32 1e-06, %v2521_v12  ;;  %v2522_v5 = vmul.f32 0.03125, %v2520_v25 }
 0x836   :  { %3285 = vrsqrt.f32 %v2523_v61  ;;  %v2524_v6 = vadd.f32 1e-06, %v2522_v5  ;;  %v2986_v5 = vld [vmem:[%s4420_s17] ss:$0 sm:$0xff]  ;;  %s2890_s17 = sshll.u32 %s3611_s16, 4  ;;  %s2891_s17 = int_to_ptr.vmem [resolvable:$true] %s2890_s17 }
 0x837   :  { %s3509_s3 = scalar_lea.vmem %s2891_s17, 256  ;;  %p3514_p3 = scmp.lt.s32.totalorder %s2891_s17, %s2891_s17 }
 0x838   :  { %3287 = vrsqrt.f32 %v2524_v6  ;;  %p3510_p2 = scmp.ne.s32.totalorder %s2891_s17, %s3509_s3  ;;  %p3515_p4 = scmp.lt.s32.totalorder %s3509_s3, %s3509_s3 }
 0x83a   :  { %p3516_p5 = por %p3515_p4, %p3514_p3 }
 0x83c   :  { %p3517_p6 = pnand %p3516_p5, %p3510_p2 }
 0x840   :  { %v3286_v7 = vpop.eup %3285 }
 0x841   :  { %v2527_v9 = vmul.f32 %v3286_v7, %v2511_v39  ;;  %v3252_v39 = vld [vmem:[%s4421_s18 + $0x14] ss:$8 sps:$4 sm:$0xff]  }
 0x842   :  { %v3288_v10 = vpop.eup %3287 }
 0x843   :  { %v2535_v11 = vmul.f32 %v2973_v2, %v2527_v9  ;;  %v2528_v13 = vmul.f32 %v3288_v10, %v2512_v54  ;;  %v3250_v54 = vld [vmem:[%s4421_s18 + $0x10] ss:$8 sps:$4 sm:$0xff]   ;;  %v2759_v10 = vsub.s32 1, %v3899_v32 }
 0x845   :  { %v2536_v62 = vmul.f32 %v2973_v2, %v2528_v13  ;;  %v2543_v14 = vadd.f32 %v2974_v26, %v2535_v11  ;;  %v2751_v11 = vld [vmem:[%s4422_s19] sm:$0x3]  ;;  %v2755_v13 = vsub.s32 0, %v3899_v32  ;;  %s3612_s19 = smov [#allocation20]  }
 0x846   :  { %s2902_s22 = sshll.u32 %s3612_s19, 4  ;;  %s4343_s22 = int_to_ptr.vmem [resolvable:$true] %s2902_s22 }
 0x847   :  { %v2544_v41 = vadd.f32 %v2974_v26, %v2536_v62  ;;  %v2760_v26 = vrot.slane %v2751_v11, %v2759_v10 }
 0x849   :  { %v2549_v15 = vpack.c.bf16 %v2544_v41, %v2543_v14 }
 0x84b   :  { %3177 = vmatmul.mubr.msk.bf16.vlgmr.msra.gmra.mrb[40].mxu0 %vm209_vm1, %v2549_v15 }
 0x84c   :  { %2818 = vmatprep.mubr.bf16.mxu0 %v3610_v53  ;;  %2787 = vmatpush1.bf16.msra.mxu0 %v3247_v22 }
 0x84d   :  { %2788 = vmatprep.subr.bf16.mxu0 %v3252_v39 }
 0x850   :  { %2789 = vmatpush1.bf16.msra.mxu0 %v3250_v54 }
 0x91e   :  { %v2606_v48 = vpop.f32.mrb[40].mxu0 }
 0x91f   :  { %v2607_v21 = vadd.f32 %v2975_v4, %v2606_v48  ;;  %v3178_v24 = vpop.f32.mrb[41].mxu0 }
 0x920   :  { %v2609_v27 = vpop.f32.mrb[42].mxu0 }
 0x921   :  { %v2610_v28 = vadd.f32 %v2975_v4, %v2609_v27  ;;  %v3179_v18 = vpop.f32.mrb[43].mxu0  ;;  %v2613_v50 = vmax.f32 %v2607_v21, 0.0 }
 0x923   :  { %v2614_v33 = vmax.f32 %v2610_v28, 0.0 }
 0x925   :  { %v2623_v60 = vpack.c.bf16 %v2614_v33, %v2613_v50 }
 0x927   :  { %3189 = vmatmul.mubr.msk.bf16.vlgmr.msra.gmra.mrb[40].mxu1 %vm2655_vm7, %v2623_v60 }
 0x9fa   :  { %v2693_v1 = vpop.f32.mrb[40].mxu1 }
 0x9fb   :  { %v2694_v29 = vadd.f32 %v2979_v0, %v2693_v1  ;;  %v3190_v30 = vpop.f32.mrb[41].mxu1 }
 0x9fc   :  { %v2696_v31 = vpop.f32.mrb[42].mxu1 }
 0x9fd   :  { %v2697_v8 = vadd.f32 %v2979_v0, %v2696_v31  ;;  %v3191_v34 = vpop.f32.mrb[43].mxu1  ;;  %v2700_v16 = vadd.f32 %v2694_v29, %v2543_v14 }
 0x9ff   :  { %v2704_v17 = vsel %vm209_vm1, %v2700_v16, 0.0  ;;  %v2701_v47 = vadd.f32 %v2697_v8, %v2544_v41  ;;  %v2756_v41 = vrot.slane %v2751_v11, %v2755_v13 }
 0xa00   :  { %2705 = vadd.xlane.f32.xlu0 %v2704_v17 }
 0xa01   :  { %v2707_v35 = vsel %vm209_vm1, %v2701_v47, 0.0 }
 0xa02   :  { %2708 = vadd.xlane.f32.xlu1 %v2707_v35 }
 0xa8d   :  { %v2706_v36 = vpop.xlane.xlu0 %2705 }
 0xa8e   :  { %v2710_v37 = vmul.f32 0.03125, %v2706_v36 }
 0xa8f   :  { %v2709_v38 = vpop.xlane.xlu1 %2708 }
 0xa90   :  { %v2712_v40 = vsub.f32 %v2700_v16, %v2710_v37  ;;  %v2711_v59 = vmul.f32 0.03125, %v2709_v38 }
 0xa92   :  { %v2713_v42 = vsub.f32 %v2701_v47, %v2711_v59  ;;  %v2714_v43 = vmul.f32 %v2712_v40, %v2712_v40 }
 0xa94   :  { %v2716_v44 = vsel %vm209_vm1, %v2714_v43, 0.0  ;;  %v2715_v45 = vmul.f32 %v2713_v42, %v2713_v42 }
 0xa95   :  { %2717 = vadd.xlane.f32.xlu0 %v2716_v44 }
 0xa96   :  { %v2719_v46 = vsel %vm209_vm1, %v2715_v45, 0.0 }
 0xa97   :  { %2720 = vadd.xlane.f32.xlu1 %v2719_v46 }
 0xb22   :  { %v2718_v49 = vpop.xlane.xlu0 %2717 }
 0xb23   :  { %v2722_v51 = vmul.f32 0.03125, %v2718_v49 }
 0xb24   :  { %v2721_v55 = vpop.xlane.xlu1 %2720 }
 0xb25   :  { %v2724_v56 = vadd.f32 1e-06, %v2722_v51  ;;  %v2723_v57 = vmul.f32 0.03125, %v2721_v55 }
 0xb27   :  { %3289 = vrsqrt.f32 %v2724_v56  ;;  %v2725_v58 = vadd.f32 1e-06, %v2723_v57 }
 0xb29   :  { %3291 = vrsqrt.f32 %v2725_v58 }
 0xb31   :  { %v3290_v63 = vpop.eup %3289 }
 0xb32   :  { %v2728_v23 = vmul.f32 %v3290_v63, %v2712_v40 }
 0xb33   :  { %v3292_v12 = vpop.eup %3291 }
 0xb34   :  { %v2736_v25 = vmul.f32 %v2985_v3, %v2728_v23  ;;  %v2729_v61 = vmul.f32 %v3292_v12, %v2713_v42 }
 0xb36   :  { %v2737_v6 = vmul.f32 %v2985_v3, %v2729_v61  ;;  %v2744_v7 = vadd.f32 %v2986_v5, %v2736_v25 }
 0xb38   :  { %v2745_v2 = vadd.f32 %v2986_v5, %v2737_v6 }
 0xb3a   :  { %v2750_v9 = vpack.c.bf16 %v2745_v2, %v2744_v7 }
 0xb3c   :  { %2991 = vmatmul.mubr.msk.bf16.vlgmr.msra.gmra.mrb[44].mxu0 %vm209_vm1, %v2750_v9 }
 0xc0f   :  { %v2820_v62 = vpop.f32.mrb[44].mxu0 }
 0xc10   :  { %v2822_v14 = vpop.f32.mrb[45].mxu0  ;;  %v2821_v48 = vadd.f32 %v2820_v62, %v2756_v41 }
 0xc11   :  { %v2823_v15 = vadd.f32 %v2822_v14, %v2760_v26  ;;  %v2824_v19 = vpop.f32.mrb[46].mxu0 }
 0xc12   :  { %v2826_v20 = vpop.f32.mrb[47].mxu0  ;;  %v2825_v21 = vadd.f32 %v2824_v19, %v2756_v41 }
 0xc13   :  { %v2827_v4 = vadd.f32 %v2826_v20, %v2760_v26  ;;  %2851 = vmax.xlane.f32.xlu0 %v2823_v15 }
 0xc15   :  { %2853 = vmax.xlane.f32.xlu1 %v2827_v4 }
 0xc17   :  { %2829 = vmax.xlane.f32.xlu0 %v2821_v48 }
 0xc19   :  { %2831 = vmax.xlane.f32.xlu1 %v2825_v21 }
 0xca0   :  { %v2852_v24 = vpop.xlane.xlu0 %2851 }
 0xca1   :  { %v2855_v27 = vsub.f32 %v2823_v15, %v2852_v24 }
 0xca2   :  { %v2854_v28 = vpop.xlane.xlu1 %2853 }
 0xca3   :  { %v2857_v18 = vmul.f32 1.442695, %v2855_v27  ;;  %v2856_v50 = vsub.f32 %v2827_v4, %v2854_v28 }
 0xca4   :  { %v2830_v32 = vpop.xlane.xlu0 %2829 }
 0xca5   :  { %3293 = vpow2.f32 %v2857_v18  ;;  %v2859_v33 = vmul.f32 1.442695, %v2856_v50  ;;  %v2833_v60 = vsub.f32 %v2821_v48, %v2830_v32 }
 0xca6   :  { %v2832_v0 = vpop.xlane.xlu1 %2831 }
 0xca7   :  { %3295 = vpow2.f32 %v2859_v33  ;;  %v2835_v1 = vmul.f32 1.442695, %v2833_v60  ;;  %v4340_v29 = vsub.f32 %v2825_v21, %v2832_v0 }
 0xca9   :  { %3297 = vpow2.f32 %v2835_v1  ;;  %v2837_v30 = vmul.f32 1.442695, %v4340_v29 }
 0xcab   :  { %3299 = vpow2.f32 %v2837_v30 }
 0xcaf   :  { %v3294_v31 = vpop.eup %3293 }
 0xcb0   :  { %2861 = vadd.xlane.f32.xlu0 %v3294_v31 }
 0xcb1   :  { %v3296_v8 = vpop.eup %3295 }
 0xcb2   :  { %2863 = vadd.xlane.f32.xlu1 %v3296_v8 }
 0xcb3   :  { %v3298_v34 = vpop.eup %3297 }
 0xcb4   :  { %2839 = vadd.xlane.f32.xlu0 %v3298_v34 }
 0xcb5   :  { %v3300_v16 = vpop.eup %3299 }
 0xcb6   :  { %2841 = vadd.xlane.f32.xlu1 %v3300_v16 }
 0xd3d   :  { %v2862_v17 = vpop.xlane.xlu0 %2861 }
 0xd3e   :  { %3301 = vlog2.f32 %v2862_v17 }
 0xd3f   :  { %v2864_v47 = vpop.xlane.xlu1 %2863 }
 0xd40   :  { %3303 = vlog2.f32 %v2864_v47 }
 0xd41   :  { %v2840_v35 = vpop.xlane.xlu0 %2839 }
 0xd42   :  { %3305 = vlog2.f32 %v2840_v35 }
 0xd43   :  { %v2842_v36 = vpop.xlane.xlu1 %2841 }
 0xd44   :  { %3307 = vlog2.f32 %v2842_v36 }
 0xd48   :  { %v3302_v37 = vpop.eup %3301 }
 0xd49   :  { %v2866_v38 = vmul.f32 0.6931472, %v3302_v37 }
 0xd4a   :  { %v3304_v40 = vpop.eup %3303 }
 0xd4b   :  { %v2869_v59 = vsub.f32 %v2855_v27, %v2866_v38  ;;  %v2868_v42 = vmul.f32 0.6931472, %v3304_v40 }
 0xd4c   :  { %v3306_v43 = vpop.eup %3305 }
 0xd4d   :  { %2871 = vst [vmem:[#allocation18] sm:$0xff] %v2869_v59  ;;  %v2870_v44 = vsub.f32 %v2856_v50, %v2868_v42  ;;  %v2844_v45 = vmul.f32 0.6931472, %v3306_v43 }
 0xd4e   :  { %v3308_v46 = vpop.eup %3307 }
 0xd4f   :  { %2872 = vst [vmem:[#allocation18 + $0x8] sm:$0xff] %v2870_v44  ;;  %v2847_v22 = vsub.f32 %v2833_v60, %v2844_v45  ;;  %v2846_v52 = vmul.f32 0.6931472, %v3308_v46 }
 0xd50   :  { %3520 = shalt.err (!%p3517_p6)
}
 0xd51   :  { %s4453_s2 = sld [smem:[#allocation36_spill]] }
 0xd57   :  { %s3521_s30 = scalar_lea.hbm %s4453_s2, 256 }
 0xd58   :  { %p3522_p7 = scmp.ne.s32.totalorder %s4453_s2, %s3521_s30  ;;  %p3525_p8 = scmp.lt.u32.totalorder %s3521_s30, %s4453_s2 }
 0xd5a   :  { %p3527_p9 = pnand %p3525_p8, %p3522_p7 }
 0xd5c   :  { %3530 = shalt.err (!%p3527_p9)
}
 0xd5d   :  { %s3614_s15 = smov 128   ;;  %2849 = vst [vmem:[#allocation17] sm:$0xff] %v2847_v22  ;;  %v2848_v39 = vsub.f32 %v4340_v29, %v2846_v52  ;;  %s3531_s29 = scalar_lea.vmem %s4343_s22, 512 }
 0xd5e   :  { %2896 = dma.vmem_to_hbm [thread:$0]  %s2891_s17, 256, %s4453_s2, [#allocation19], %s3614_s15, %s3614_s15, %s3608_s5  }
 0xd5f   :  { %p3532_p10 = scmp.ne.s32.totalorder %s4343_s22, %s3531_s29  ;;  %p3536_p11 = scmp.lt.s32.totalorder %s4343_s22, %s4343_s22 }
 0xd60   :  { %p3537_p12 = scmp.lt.s32.totalorder %s3531_s29, %s3531_s29 }
 0xd62   :  { %p3538_p13 = por %p3537_p12, %p3536_p11 }
 0xd64   :  { %p3539_p0 = pnand %p3538_p13, %p3532_p10 }
 0xd66   :  { %3542 = shalt.err (!%p3539_p0)
}
 0xd67   :  { %s4454_s6 = sld [smem:[#allocation37_spill]] }
 0xd6d   :  { %s3543_s9 = scalar_lea.hbm %s4454_s6, 512 }
 0xd6e   :  { %p3544_p1 = scmp.ne.s32.totalorder %s4454_s6, %s3543_s9  ;;  %p3547_p2 = scmp.lt.u32.totalorder %s3543_s9, %s4454_s6 }
 0xd70   :  { %p3549_p3 = pnand %p3547_p2, %p3544_p1 }
 0xd72   :  { %3552 = shalt.err (!%p3549_p3)
}
 0xd73   :  { %2908 = dma.vmem_to_hbm [thread:$0]  %s4343_s22, 512, %s4454_s6, [#allocation19], %s3590_s25, %s3590_s25, %s3591_s26   ;;  %2850 = vst [vmem:[#allocation17 + $0x8] sm:$0xff] %v2848_v39 }
 0xd74   :  { %s3553_s17 = scalar_lea.vmem %s4345_s27, 256  ;;  %p3558_p5 = scmp.lt.s32.totalorder %s4345_s27, %s4345_s27 }
 0xd75   :  { %p3554_p4 = scmp.ne.s32.totalorder %s4345_s27, %s3553_s17  ;;  %p3559_p6 = scmp.lt.s32.totalorder %s3553_s17, %s3553_s17 }
 0xd77   :  { %p3560_p7 = por %p3559_p6, %p3558_p5 }
 0xd79   :  { %p3561_p8 = pnand %p3560_p7, %p3554_p4 }
 0xd7b   :  { %3564 = shalt.err (!%p3561_p8)
}
 0xd7c   :  { %s4455_s3 = sld [smem:[#allocation35_spill]] }
 0xd82   :  { %s3565_s1 = scalar_lea.hbm %s4455_s3, 256 }
 0xd83   :  { %p3566_p9 = scmp.ne.s32.totalorder %s4455_s3, %s3565_s1  ;;  %p3569_p10 = scmp.lt.u32.totalorder %s3565_s1, %s4455_s3 }
 0xd85   :  { %p3571_p11 = pnand %p3569_p10, %p3566_p9 }
 0xd87   :  { %3574 = shalt.err (!%p3571_p11)
}
 0xd88   :  { %2884 = dma.vmem_to_hbm [thread:$0]  %s4345_s27, 256, %s4455_s3, [#allocation4], %s3614_s15, %s3614_s15, %s3608_s5  }
 0xd89   :  { %3585 = dma.done.wait [#allocation4], 256  }
 0xd8a   :  { %3586 = vsyncadd [#allocation4], 4294967040 }
 0xd8b   :  { %3587 = dma.done.wait [#allocation19], 768  }
 0xd8c   :  { %3588 = vsyncadd [#allocation19], 4294966528 }
 0xd8d   :  { %2918 = vsyncpa [#allocation3], 1 }
 0xd8e   :  { %2919 = vsyncpa [#allocation6], 1 }
 0xd8f   :  { %2920 = vsyncpa [#allocation9], 1 }
 0xd90   :  { %2921 = vsyncpa [#allocation12], 1 }
 0xd91   :  { %2922 = vsyncpa [#allocation15], 1 }
 0xd92   :  { %2923 = vsyncpa [#allocation4], 1 }
 0xd93   :  { %2924 = vsyncpa [#allocation19], 1 }

</bundles_post_ra>
